<compile_context>
chip_gen: v6e
topology: v6e:2x2x1
jax: 0.10.0
libtpu: 0.0.40
codegen_flags: <defaults>
</compile_context>

<pallas_src>
import math
import functools
import numpy as np

import jax
import jax.numpy as jnp
from jax.experimental import pallas as pl
from jax.experimental.pallas import tpu as pltpu

F32 = jnp.float32
BF16 = jnp.bfloat16
BN_EPS = 1e-5
BN_SCALE = 1.0 / math.sqrt(1.0 + BN_EPS)   # eval-mode BN with default running stats


# ----------------------------------------------------------------------------
# Pallas kernels
# ----------------------------------------------------------------------------
def molconv_kernel(xc_ref, slab_ref, wc_ref, bc_ref, wd_ref, bd_ref,
                   wu_ref, bu_ref, out_ref, *, k, cmid):
    """Fused MolConv for one row block; the k axis is folded into the matmul.

      xc   : [TR, cin]       bf16  center features
      slab : [k, TR, cmid+1] bf16  [neighbour | gm2 | dist] per neighbour index
      wc   : [cin, cmid+1]   bf16  center_ff weight (BN folded; last col unused)
      wu   : [cmid+1, cout]  bf16  update_ff weight (BN folded; last row zero)
      out  : [TR, cout]      f32   mean over the k neighbours
    """
    tr = xc_ref.shape[0]

    # center_ff: 1x1 conv + folded BN + sigmoid (k-independent)   [TR, cmid+1]
    center = jax.nn.sigmoid(
        jnp.dot(xc_ref[...], wc_ref[...], preferred_element_type=jnp.float32)
        + bc_ref[...])

    slab = slab_ref[...].astype(jnp.float32)                 # [k, TR, cmid+1]

    # dist_ff: scalar affine + folded BN + sigmoid on the appended dist channel
    w = jax.nn.sigmoid(slab[:, :, cmid:cmid + 1] * wd_ref[...] + bd_ref[...])

    # feat = w * [neighbour | gm2 | dist] + sigmoid(center)
    # (dist channel is neutralised by the zero row of wu)
    f = w * slab + center[None, :, :]                         # [k, TR, cmid+1]

    # update_ff: ONE matmul over all k neighbours + folded BN + LeakyReLU(0.02)
    f2 = f.reshape(k * tr, cmid + 1).astype(jnp.bfloat16)
    u = (jnp.dot(f2, wu_ref[...], preferred_element_type=jnp.float32)
         + bu_ref[...])                                       # [k*TR, cout]
    u = jnp.where(u >= 0, u, 0.02 * u)

    # mean over the k neighbours (in-register reduction, single store)
    out_ref[...] = jnp.mean(u.reshape(k, tr, -1), axis=0)


def head_kernel(*refs, n_blocks, use_softmax):
    """Fused encoder-merge + FCRes decoder + final FC + activation.

    refs = (pooled [B, emb], w_merge, b_merge,
            [S, w1, b1, w2, b2, w3, b3] * n_blocks,
            w_fc, b_fc, out_ref)
    """
    out_ref = refs[-1]
    ins = refs[:-1]

    p = ins[0][...]                                        # [B, emb] = p1 + p2

    # Encoder.merge: Linear + folded BN + LeakyReLU(0.2)
    h = jnp.dot(p, ins[1][...], preferred_element_type=jnp.float32) + ins[2][...]
    h = jnp.where(h >= 0, h, 0.2 * h)

    o = 3
    for _ in range(n_blocks):
        S, w1, b1, w2, b2, w3, b3 = (ins[o + t][...] for t in range(7))
        o += 7
        ident = jnp.dot(h, S, preferred_element_type=jnp.float32)  # nearest interp
        t1 = jnp.dot(h, w1, preferred_element_type=jnp.float32) + b1
        t1 = jnp.where(t1 >= 0, t1, 0.2 * t1)
        t2 = jnp.dot(t1, w2, preferred_element_type=jnp.float32) + b2
        t2 = jnp.where(t2 >= 0, t2, 0.2 * t2)
        t3 = jnp.dot(t2, w3, preferred_element_type=jnp.float32) + b3
        h = t3 + ident
        # TODO(synk): FCResBlock dropout omitted (identity in eval mode).

    y = jnp.dot(h, ins[o][...], preferred_element_type=jnp.float32) + ins[o + 1][...]
    if use_softmax:
        y = y - jnp.max(y, axis=1, keepdims=True)
        e = jnp.exp(y)
        y = e / jnp.sum(e, axis=1, keepdims=True)
    else:
        y = jax.nn.sigmoid(y)
    out_ref[...] = y


# ----------------------------------------------------------------------------
# Wrappers
# ----------------------------------------------------------------------------
def _full_spec(arr):
    """Whole-array block with constant index (fetched once, kept resident)."""
    shape = arr.shape
    return pl.BlockSpec(shape, lambda *_: (0,) * len(shape))


def _round_up(x, m):
    return ((x + m - 1) // m) * m


def _choose_tile(rows, k, max_tile=2048, fused_row_budget=8192):
    """Row tile (multiple of 32) and padded row count for the MolConv grid.

    Large tiles amortise per-grid-step overhead; k*tile is capped so the fused
    [k*TR, C] slab stays small; >=2 blocks when possible so v7x's 2 TCs are
    both used via the "parallel" grid axis.
    """
    cap = min(max_tile, max(32, (fused_row_budget // max(k, 1)) // 32 * 32))
    r = _round_up(rows, 32)
    if r <= cap:
        tr = _round_up((r + 1) // 2, 32) if r >= 64 else r
    else:
        tr = cap
    return tr, _round_up(r, tr)


def molconv_forward(xt, p, k, remove_xyz):
    """xt: [B, N, C] f32 point features.  Returns [B, N, out_dim] f32."""
    B, N, C = xt.shape
    R = B * N

    # ---- kNN (pairwise distance + top-k) — plain JAX glue ----------------
    dots = jnp.einsum('bnc,bmc->bnm', xt, xt)
    sq = jnp.sum(xt * xt, axis=-1)
    pd = 2.0 * dots - sq[:, :, None] - sq[:, None, :]        # -||xi - xj||^2
    neg_dist, idx = jax.lax.top_k(pd, k)                     # [B, N, k]
    dist = -neg_dist                                         # squared distances

    # ---- neighbour gather directly in k-major layout ----------------------
    idx_t = jnp.transpose(idx, (2, 0, 1))                    # [k, B, N]
    neigh_full = xt[jnp.arange(B)[None, :, None], idx_t]     # [k, B, N, C]

    # ---- gram feature gm2 (k-major) ---------------------------------------
    # sub[w,b,n] = <graph_feat[b,n,w,:], graph_feat[b,n,0,:]>
    sub = jnp.einsum('jbnc,bnc->jbn', neigh_full, neigh_full[0])     # [k,B,N]
    gm2 = sub[:, :, :, None] * jnp.transpose(sub, (1, 2, 0))[None]   # [k,B,N,k]
    # F.normalize(dim=1) is applied to [B, N, k, k] BEFORE the NCHW permute,
    # i.e. over the point dimension N == axis 2 of our [k, B, N, k] layout.
    norm = jnp.sqrt(jnp.sum(gm2 * gm2, axis=2, keepdims=True))
    gm2 = gm2 / jnp.maximum(norm, 1e-12)

    if remove_xyz:
        xc, neigh = xt[..., 3:], neigh_full[..., 3:]
    else:
        xc, neigh = xt, neigh_full
    cin = xc.shape[-1]
    cmid = cin + k
    cout = p['wu'].shape[1]

    # ---- one bf16 slab [k, R, cmid+1] = [neighbour | gm2 | dist] ----------
    dist_km = jnp.transpose(dist, (2, 0, 1))[..., None]      # [k, B, N, 1]
    slab = jnp.concatenate([neigh, gm2, dist_km], axis=-1)   # [k, B, N, cmid+1]
    slab2 = slab.reshape(k, R, cmid + 1).astype(BF16)
    xc2 = xc.reshape(R, cin).astype(BF16)

    tr, Rp = _choose_tile(R, k)
    if Rp != R:
        padn = Rp - R
        xc2 = jnp.pad(xc2, ((0, padn), (0, 0)))
        slab2 = jnp.pad(slab2, ((0, 0), (0, padn), (0, 0)))

    grid = (Rp // tr,)

    out = pl.pallas_call(
        functools.partial(molconv_kernel, k=k, cmid=cmid),
        out_shape=jax.ShapeDtypeStruct((Rp, cout), F32),
        grid_spec=pltpu.PrefetchScalarGridSpec(
            num_scalar_prefetch=0,
            grid=grid,
            in_specs=[
                pl.BlockSpec((tr, cin), lambda i: (i, 0)),              # xc
                pl.BlockSpec((k, tr, cmid + 1), lambda i: (0, i, 0)),   # slab
                _full_spec(p['wc']), _full_spec(p['bc']),
                _full_spec(p['wd']), _full_spec(p['bd']),
                _full_spec(p['wu']), _full_spec(p['bu']),
            ],
            out_specs=pl.BlockSpec((tr, cout), lambda i: (i, 0)),
        ),
        compiler_params=pltpu.CompilerParams(
            dimension_semantics=("parallel",),
            vmem_limit_bytes=32 * 1024 * 1024),
    )(xc2, slab2, p['wc'], p['bc'], p['wd'], p['bd'], p['wu'], p['bu'])

    return out[:R].reshape(B, N, cout)


def head_forward(pooled, params):
    """pooled: [B, emb] (max+mean pooled encoder features) -> [B, out_ch]."""
    B = pooled.shape[0]
    mp = params['encoder']['merge']
    fcp = params['decoder']['fc']
    blocks = params['decoder']['blocks']

    flat = [pooled, mp['w'], mp['b']]
    for bp in blocks:
        flat += [bp['S'], bp['w1'], bp['b1'], bp['w2'], bp['b2'], bp['w3'], bp['b3']]
    flat += [fcp['w'], fcp['b']]

    out_channels = fcp['w'].shape[1]
    kern = functools.partial(head_kernel, n_blocks=len(blocks),
                             use_softmax=(out_channels > 1))
    return pl.pallas_call(
        kern,
        out_shape=jax.ShapeDtypeStruct((B, out_channels), F32),
        in_specs=[pl.BlockSpec(memory_space=pltpu.MemorySpace.VMEM)] * len(flat),
        out_specs=pl.BlockSpec(memory_space=pltpu.MemorySpace.VMEM),
    )(*flat)


def molnet_csp_forward(x, idx_base, params, k):
    """x: [B, C, N] (PyTorch layout).  idx_base kept for API parity (unused:
    the JAX version gathers per batch element via indexing)."""
    del idx_base
    xt = jnp.transpose(x, (0, 2, 1)).astype(F32)             # [B, N, C]

    # Per-layer max+mean pooling (pool-of-concat == concat-of-pools), so the
    # [B, N, emb] concat is never materialised in HBM.
    pooled_parts, cur = [], xt
    for i, lp in enumerate(params['encoder']['convs']):
        cur = molconv_forward(cur, lp, k, remove_xyz=(i == 0))
        pooled_parts.append(jnp.max(cur, axis=1) + jnp.mean(cur, axis=1))
    pooled = jnp.concatenate(pooled_parts, axis=-1)           # [B, emb]
    return head_forward(pooled, params)                       # [B, out_channels]


# ----------------------------------------------------------------------------
# Deterministic parameter init (kaiming a=0.2 fan_in; BN eval defaults folded)
# ----------------------------------------------------------------------------
def kaiming_t(key, fan_in, fan_out):
    gain = math.sqrt(2.0 / (1.0 + 0.2 ** 2))
    std = gain / math.sqrt(fan_in)
    return std * jax.random.normal(key, (fan_in, fan_out), F32)


def uniform_bias(key, fan_in, n):
    bound = 1.0 / math.sqrt(fan_in)
    return jax.random.uniform(key, (1, n), F32, -bound, bound)


def interp_matrix(in_dim, out_dim):
    """F.interpolate(mode='nearest') along features as a one-hot matmul."""
    src = np.minimum(np.floor(np.arange(out_dim) * (in_dim / out_dim)).astype(np.int64),
                     in_dim - 1)
    m = np.zeros((in_dim, out_dim), np.float32)
    m[src, np.arange(out_dim)] = 1.0
    return jnp.asarray(m)


def init_molconv(key, in_dim, out_dim, k, remove_xyz):
    """BN (eval, default stats) folded into weights.  Merged center/update
    weights operate on the full [neighbour | gm2 | dist] slab: the extra dist
    channel has a zero row in the update weight (its contribution is 0)."""
    cin = in_dim - 3 if remove_xyz else in_dim
    cmid = cin + k
    kd, kc, ku = jax.random.split(key, 3)
    wd = kaiming_t(kd, 1, 1) * BN_SCALE               # dist_ff conv (bias=False)
    wc = kaiming_t(kc, cin, cmid) * BN_SCALE          # center_ff conv (bias=False)
    wu = kaiming_t(ku, cmid, out_dim) * BN_SCALE      # update_ff conv (bias=False)
    wc_pad = jnp.concatenate([wc, jnp.zeros((cin, 1), F32)], axis=1)      # unused col
    wu_pad = jnp.concatenate([wu, jnp.zeros((1, out_dim), F32)], axis=0)  # zero row
    return dict(
        wd=wd, bd=jnp.zeros((1, 1), F32),
        wc=wc_pad.astype(BF16), bc=jnp.zeros((1, cmid + 1), F32),
        wu=wu_pad.astype(BF16), bu=jnp.zeros((1, out_dim), F32),
    )


def init_fcres(key, in_dim, out_dim):
    k1, k2, kb2, k3, kb3 = jax.random.split(key, 5)
    return dict(
        S=interp_matrix(in_dim, out_dim),
        w1=kaiming_t(k1, in_dim, out_dim) * BN_SCALE,
        b1=jnp.zeros((1, out_dim), F32),
        w2=kaiming_t(k2, out_dim, out_dim) * BN_SCALE,
        b2=uniform_bias(kb2, out_dim, out_dim) * BN_SCALE,
        w3=kaiming_t(k3, out_dim, out_dim) * BN_SCALE,
        b3=uniform_bias(kb3, out_dim, out_dim) * BN_SCALE,
    )


def init_params(key, in_channels, encoder_layers, emb_dim, k,
                decoder_layers, out_channels):
    keys = iter(jax.random.split(key, 32))
    convs, prev = [], in_channels
    for i, od in enumerate(encoder_layers):
        convs.append(init_molconv(next(keys), prev, od, k, remove_xyz=(i == 0)))
        prev = od
    kw, kb = jax.random.split(next(keys))
    merge = dict(w=kaiming_t(kw, emb_dim, emb_dim) * BN_SCALE,
                 b=uniform_bias(kb, emb_dim, emb_dim) * BN_SCALE)
    blocks, prev = [], emb_dim
    for od in decoder_layers:
        blocks.append(init_fcres(next(keys), prev, od))
        prev = od
    kw, kb = jax.random.split(next(keys))
    fc = dict(w=kaiming_t(kw, prev, out_channels),
              b=uniform_bias(kb, prev, out_channels))
    return dict(encoder=dict(convs=convs, merge=merge),
                decoder=dict(blocks=blocks, fc=fc))


# ----------------------------------------------------------------------------
if __name__ == "__main__":
    B, C, N, K = 2, 8, 16, 4                      # batch, in_channels, num_atoms, k
    encoder_layers = [8, 16]
    emb_dim = sum(encoder_layers)                 # 24 (concat of encoder outputs)
    decoder_layers = [32, 16]
    out_channels = 4                              # > 1 -> softmax activation

    key = jax.random.PRNGKey(0)
    kx, kp = jax.random.split(key)
    x = jax.random.normal(kx, (B, C, N), F32)     # point set [B, in_channels, num_atoms]
    idx_base = (jnp.arange(B, dtype=jnp.int32) * N).reshape(B, 1, 1)

    params = init_params(kp, C, encoder_layers, emb_dim, K,
                         decoder_layers, out_channels)

    fwd = jax.jit(lambda xx, ib, pp: molnet_csp_forward(xx, ib, pp, K))
    out = jax.block_until_ready(fwd(x, idx_base, params))

    assert out.shape == (B, out_channels), out.shape
    assert bool(jnp.all(jnp.isfinite(out)))
    assert bool(jnp.allclose(jnp.sum(out, axis=1), 1.0, atol=1e-5))  # softmax rows
    print("KERNEL_OK")
</pallas_src>

<mosaic_0001>
module attributes {stable_mosaic.version = 11 : i64} {
  func.func @molconv_kernel(%arg0: i32, %arg1: memref<32x5xbf16, #tpu.memory_space<vmem>>, %arg2: memref<4x32x10xbf16, #tpu.memory_space<vmem>>, %arg3: memref<5x10xbf16, #tpu.memory_space<vmem>>, %arg4: memref<1x10xf32, #tpu.memory_space<vmem>>, %arg5: memref<1x1xf32, #tpu.memory_space<vmem>>, %arg6: memref<1x1xf32, #tpu.memory_space<vmem>>, %arg7: memref<10x8xbf16, #tpu.memory_space<vmem>>, %arg8: memref<1x8xf32, #tpu.memory_space<vmem>>, %arg9: memref<32x8xf32, #tpu.memory_space<vmem>>) attributes {dimension_semantics = [#tpu.dimension_semantics<parallel>], iteration_bounds = array<i64: 1>, scalar_prefetch = 0 : i64, scratch_operands = 0 : i64, tpu.core_type = #tpu.core_type<tc>, window_params = [{transform_indices = @transform_0, window_bounds = array<i64: 32, 5>}, {transform_indices = @transform_1, window_bounds = array<i64: 4, 32, 10>}, {pipeline_mode = #tpu.pipeline_mode<synchronous>, transform_indices = @transform_2, window_bounds = array<i64: 5, 10>}, {pipeline_mode = #tpu.pipeline_mode<synchronous>, transform_indices = @transform_3, window_bounds = array<i64: 1, 10>}, {pipeline_mode = #tpu.pipeline_mode<synchronous>, transform_indices = @transform_4, window_bounds = array<i64: 1, 1>}, {pipeline_mode = #tpu.pipeline_mode<synchronous>, transform_indices = @transform_5, window_bounds = array<i64: 1, 1>}, {pipeline_mode = #tpu.pipeline_mode<synchronous>, transform_indices = @transform_6, window_bounds = array<i64: 10, 8>}, {pipeline_mode = #tpu.pipeline_mode<synchronous>, transform_indices = @transform_7, window_bounds = array<i64: 1, 8>}, {transform_indices = @transform_8, window_bounds = array<i64: 32, 8>}]} {
    %c0 = arith.constant 0 : index
    %c0_0 = arith.constant 0 : index
    %0 = vector.load %arg1[%c0, %c0_0] : memref<32x5xbf16, #tpu.memory_space<vmem>>, vector<32x5xbf16>
    %c0_1 = arith.constant 0 : index
    %c0_2 = arith.constant 0 : index
    %1 = vector.load %arg3[%c0_1, %c0_2] : memref<5x10xbf16, #tpu.memory_space<vmem>>, vector<5x10xbf16>
    %cst = arith.constant dense<0.000000e+00> : vector<32x10xf32>
    %2 = tpu.matmul %0, %1, %cst {dimension_numbers = #tpu.dot_dimension_numbers<[1], [0], [0], [1], [0, 0, 1, 1], [], []>} : vector<32x5xbf16>, vector<5x10xbf16>, vector<32x10xf32> -> vector<32x10xf32>
    %c0_3 = arith.constant 0 : index
    %c0_4 = arith.constant 0 : index
    %3 = vector.load %arg4[%c0_3, %c0_4] : memref<1x10xf32, #tpu.memory_space<vmem>>, vector<1x10xf32>
    %4 = vector.broadcast %3 : vector<1x10xf32> to vector<32x10xf32>
    %5 = arith.addf %2, %4 : vector<32x10xf32>
    %6 = arith.negf %5 : vector<32x10xf32>
    %7 = math.exp %6 : vector<32x10xf32>
    %cst_5 = arith.constant 1.000000e+00 : f32
    %8 = vector.broadcast %cst_5 : f32 to vector<32x10xf32>
    %9 = arith.addf %8, %7 : vector<32x10xf32>
    %10 = arith.divf %8, %9 : vector<32x10xf32>
    %c0_6 = arith.constant 0 : index
    %c0_7 = arith.constant 0 : index
    %c0_8 = arith.constant 0 : index
    %11 = vector.load %arg2[%c0_6, %c0_7, %c0_8] : memref<4x32x10xbf16, #tpu.memory_space<vmem>>, vector<4x32x10xbf16>
    %12 = arith.extf %11 : vector<4x32x10xbf16> to vector<4x32x10xf32>
    %13 = vector.extract_strided_slice %12 {offsets = [0, 0, 9], sizes = [4, 32, 1], strides = [1, 1, 1]} : vector<4x32x10xf32> to vector<4x32x1xf32>
    %c0_9 = arith.constant 0 : index
    %c0_10 = arith.constant 0 : index
    %14 = vector.load %arg5[%c0_9, %c0_10] : memref<1x1xf32, #tpu.memory_space<vmem>>, vector<1x1xf32>
    %15 = vector.shape_cast %14 : vector<1x1xf32> to vector<1x1x1xf32>
    %16 = vector.broadcast %15 : vector<1x1x1xf32> to vector<4x32x1xf32>
    %17 = arith.mulf %13, %16 : vector<4x32x1xf32>
    %c0_11 = arith.constant 0 : index
    %c0_12 = arith.constant 0 : index
    %18 = vector.load %arg6[%c0_11, %c0_12] : memref<1x1xf32, #tpu.memory_space<vmem>>, vector<1x1xf32>
    %19 = vector.shape_cast %18 : vector<1x1xf32> to vector<1x1x1xf32>
    %20 = vector.broadcast %19 : vector<1x1x1xf32> to vector<4x32x1xf32>
    %21 = arith.addf %17, %20 : vector<4x32x1xf32>
    %22 = arith.negf %21 : vector<4x32x1xf32>
    %23 = math.exp %22 : vector<4x32x1xf32>
    %cst_13 = arith.constant 1.000000e+00 : f32
    %24 = vector.broadcast %cst_13 : f32 to vector<4x32x1xf32>
    %25 = arith.addf %24, %23 : vector<4x32x1xf32>
    %26 = arith.divf %24, %25 : vector<4x32x1xf32>
    %27 = vector.broadcast %26 : vector<4x32x1xf32> to vector<4x32x10xf32>
    %28 = arith.mulf %27, %12 : vector<4x32x10xf32>
    %29 = vector.shape_cast %10 : vector<32x10xf32> to vector<1x32x10xf32>
    %30 = vector.broadcast %29 : vector<1x32x10xf32> to vector<4x32x10xf32>
    %31 = arith.addf %28, %30 : vector<4x32x10xf32>
    %32 = vector.shape_cast %31 : vector<4x32x10xf32> to vector<128x10xf32>
    %33 = arith.truncf %32 : vector<128x10xf32> to vector<128x10xbf16>
    %c0_14 = arith.constant 0 : index
    %c0_15 = arith.constant 0 : index
    %34 = vector.load %arg7[%c0_14, %c0_15] : memref<10x8xbf16, #tpu.memory_space<vmem>>, vector<10x8xbf16>
    %cst_16 = arith.constant dense<0.000000e+00> : vector<128x8xf32>
    %35 = tpu.matmul %33, %34, %cst_16 {dimension_numbers = #tpu.dot_dimension_numbers<[1], [0], [0], [1], [0, 0, 1, 1], [], []>} : vector<128x10xbf16>, vector<10x8xbf16>, vector<128x8xf32> -> vector<128x8xf32>
    %c0_17 = arith.constant 0 : index
    %c0_18 = arith.constant 0 : index
    %36 = vector.load %arg8[%c0_17, %c0_18] : memref<1x8xf32, #tpu.memory_space<vmem>>, vector<1x8xf32>
    %37 = vector.broadcast %36 : vector<1x8xf32> to vector<128x8xf32>
    %38 = arith.addf %35, %37 : vector<128x8xf32>
    %cst_19 = arith.constant 0.000000e+00 : f32
    %39 = vector.broadcast %cst_19 : f32 to vector<128x8xf32>
    %40 = arith.cmpf oge, %38, %39 : vector<128x8xf32>
    %cst_20 = arith.constant 2.000000e-02 : f32
    %41 = vector.broadcast %cst_20 : f32 to vector<128x8xf32>
    %42 = arith.mulf %41, %38 : vector<128x8xf32>
    %43 = arith.select %40, %38, %42 : vector<128x8xi1>, vector<128x8xf32>
    %44 = vector.shape_cast %43 : vector<128x8xf32> to vector<4x32x8xf32>
    %cst_21 = arith.constant dense<0.000000e+00> : vector<32x8xf32>
    %45 = vector.multi_reduction <add>, %44, %cst_21 [0] : vector<4x32x8xf32> to vector<32x8xf32>
    %cst_22 = arith.constant 4.000000e+00 : f32
    %46 = vector.broadcast %cst_22 : f32 to vector<32x8xf32>
    %47 = arith.divf %45, %46 : vector<32x8xf32>
    %c0_23 = arith.constant 0 : index
    %c0_24 = arith.constant 0 : index
    %48 = vector.load %arg9[%c0_23, %c0_24] : memref<32x8xf32, #tpu.memory_space<vmem>>, vector<32x8xf32>
    tpu.vector_store %arg9[%c0_23, %c0_24], %47 {strides = array<i32>} : memref<32x8xf32, #tpu.memory_space<vmem>>, vector<32x8xf32>,
    return
  }
  func.func @transform_0(%arg0: i32) -> (i32, i32) {
    %c0_i32 = arith.constant 0 : i32
    %c0_i32_0 = arith.constant 0 : i32
    return %arg0, %c0_i32 : i32, i32
  }
  func.func @transform_1(%arg0: i32) -> (i32, i32, i32) {
    %c0_i32 = arith.constant 0 : i32
    %c0_i32_0 = arith.constant 0 : i32
    %c0_i32_1 = arith.constant 0 : i32
    return %c0_i32, %arg0, %c0_i32_0 : i32, i32, i32
  }
  func.func @transform_2(%arg0: i32) -> (i32, i32) {
    %c0_i32 = arith.constant 0 : i32
    %c0_i32_0 = arith.constant 0 : i32
    %c0_i32_1 = arith.constant 0 : i32
    return %c0_i32, %c0_i32_0 : i32, i32
  }
  func.func @transform_3(%arg0: i32) -> (i32, i32) {
    %c0_i32 = arith.constant 0 : i32
    %c0_i32_0 = arith.constant 0 : i32
    %c0_i32_1 = arith.constant 0 : i32
    return %c0_i32, %c0_i32_0 : i32, i32
  }
  func.func @transform_4(%arg0: i32) -> (i32, i32) {
    %c0_i32 = arith.constant 0 : i32
    %c0_i32_0 = arith.constant 0 : i32
    %c0_i32_1 = arith.constant 0 : i32
    return %c0_i32, %c0_i32_0 : i32, i32
  }
  func.func @transform_5(%arg0: i32) -> (i32, i32) {
    %c0_i32 = arith.constant 0 : i32
    %c0_i32_0 = arith.constant 0 : i32
    %c0_i32_1 = arith.constant 0 : i32
    return %c0_i32, %c0_i32_0 : i32, i32
  }
  func.func @transform_6(%arg0: i32) -> (i32, i32) {
    %c0_i32 = arith.constant 0 : i32
    %c0_i32_0 = arith.constant 0 : i32
    %c0_i32_1 = arith.constant 0 : i32
    return %c0_i32, %c0_i32_0 : i32, i32
  }
  func.func @transform_7(%arg0: i32) -> (i32, i32) {
    %c0_i32 = arith.constant 0 : i32
    %c0_i32_0 = arith.constant 0 : i32
    %c0_i32_1 = arith.constant 0 : i32
    return %c0_i32, %c0_i32_0 : i32, i32
  }
  func.func @transform_8(%arg0: i32) -> (i32, i32) {
    %c0_i32 = arith.constant 0 : i32
    %c0_i32_0 = arith.constant 0 : i32
    return %arg0, %c0_i32 : i32, i32
  }
}

module attributes {stable_mosaic.version = 11 : i64} {
  func.func @molconv_kernel(%arg0: i32, %arg1: memref<32x8xbf16, #tpu.memory_space<vmem>>, %arg2: memref<4x32x13xbf16, #tpu.memory_space<vmem>>, %arg3: memref<8x13xbf16, #tpu.memory_space<vmem>>, %arg4: memref<1x13xf32, #tpu.memory_space<vmem>>, %arg5: memref<1x1xf32, #tpu.memory_space<vmem>>, %arg6: memref<1x1xf32, #tpu.memory_space<vmem>>, %arg7: memref<13x16xbf16, #tpu.memory_space<vmem>>, %arg8: memref<1x16xf32, #tpu.memory_space<vmem>>, %arg9: memref<32x16xf32, #tpu.memory_space<vmem>>) attributes {dimension_semantics = [#tpu.dimension_semantics<parallel>], iteration_bounds = array<i64: 1>, scalar_prefetch = 0 : i64, scratch_operands = 0 : i64, tpu.core_type = #tpu.core_type<tc>, window_params = [{transform_indices = @transform_0, window_bounds = array<i64: 32, 8>}, {transform_indices = @transform_1, window_bounds = array<i64: 4, 32, 13>}, {pipeline_mode = #tpu.pipeline_mode<synchronous>, transform_indices = @transform_2, window_bounds = array<i64: 8, 13>}, {pipeline_mode = #tpu.pipeline_mode<synchronous>, transform_indices = @transform_3, window_bounds = array<i64: 1, 13>}, {pipeline_mode = #tpu.pipeline_mode<synchronous>, transform_indices = @transform_4, window_bounds = array<i64: 1, 1>}, {pipeline_mode = #tpu.pipeline_mode<synchronous>, transform_indices = @transform_5, window_bounds = array<i64: 1, 1>}, {pipeline_mode = #tpu.pipeline_mode<synchronous>, transform_indices = @transform_6, window_bounds = array<i64: 13, 16>}, {pipeline_mode = #tpu.pipeline_mode<synchronous>, transform_indices = @transform_7, window_bounds = array<i64: 1, 16>}, {transform_indices = @transform_8, window_bounds = array<i64: 32, 16>}]} {
    %c0 = arith.constant 0 : index
    %c0_0 = arith.constant 0 : index
    %0 = vector.load %arg1[%c0, %c0_0] : memref<32x8xbf16, #tpu.memory_space<vmem>>, vector<32x8xbf16>
    %c0_1 = arith.constant 0 : index
    %c0_2 = arith.constant 0 : index
    %1 = vector.load %arg3[%c0_1, %c0_2] : memref<8x13xbf16, #tpu.memory_space<vmem>>, vector<8x13xbf16>
    %cst = arith.constant dense<0.000000e+00> : vector<32x13xf32>
    %2 = tpu.matmul %0, %1, %cst {dimension_numbers = #tpu.dot_dimension_numbers<[1], [0], [0], [1], [0, 0, 1, 1], [], []>} : vector<32x8xbf16>, vector<8x13xbf16>, vector<32x13xf32> -> vector<32x13xf32>
    %c0_3 = arith.constant 0 : index
    %c0_4 = arith.constant 0 : index
    %3 = vector.load %arg4[%c0_3, %c0_4] : memref<1x13xf32, #tpu.memory_space<vmem>>, vector<1x13xf32>
    %4 = vector.broadcast %3 : vector<1x13xf32> to vector<32x13xf32>
    %5 = arith.addf %2, %4 : vector<32x13xf32>
    %6 = arith.negf %5 : vector<32x13xf32>
    %7 = math.exp %6 : vector<32x13xf32>
    %cst_5 = arith.constant 1.000000e+00 : f32
    %8 = vector.broadcast %cst_5 : f32 to vector<32x13xf32>
    %9 = arith.addf %8, %7 : vector<32x13xf32>
    %10 = arith.divf %8, %9 : vector<32x13xf32>
    %c0_6 = arith.constant 0 : index
    %c0_7 = arith.constant 0 : index
    %c0_8 = arith.constant 0 : index
    %11 = vector.load %arg2[%c0_6, %c0_7, %c0_8] : memref<4x32x13xbf16, #tpu.memory_space<vmem>>, vector<4x32x13xbf16>
    %12 = arith.extf %11 : vector<4x32x13xbf16> to vector<4x32x13xf32>
    %13 = vector.extract_strided_slice %12 {offsets = [0, 0, 12], sizes = [4, 32, 1], strides = [1, 1, 1]} : vector<4x32x13xf32> to vector<4x32x1xf32>
    %c0_9 = arith.constant 0 : index
    %c0_10 = arith.constant 0 : index
    %14 = vector.load %arg5[%c0_9, %c0_10] : memref<1x1xf32, #tpu.memory_space<vmem>>, vector<1x1xf32>
    %15 = vector.shape_cast %14 : vector<1x1xf32> to vector<1x1x1xf32>
    %16 = vector.broadcast %15 : vector<1x1x1xf32> to vector<4x32x1xf32>
    %17 = arith.mulf %13, %16 : vector<4x32x1xf32>
    %c0_11 = arith.constant 0 : index
    %c0_12 = arith.constant 0 : index
    %18 = vector.load %arg6[%c0_11, %c0_12] : memref<1x1xf32, #tpu.memory_space<vmem>>, vector<1x1xf32>
    %19 = vector.shape_cast %18 : vector<1x1xf32> to vector<1x1x1xf32>
    %20 = vector.broadcast %19 : vector<1x1x1xf32> to vector<4x32x1xf32>
    %21 = arith.addf %17, %20 : vector<4x32x1xf32>
    %22 = arith.negf %21 : vector<4x32x1xf32>
    %23 = math.exp %22 : vector<4x32x1xf32>
    %cst_13 = arith.constant 1.000000e+00 : f32
    %24 = vector.broadcast %cst_13 : f32 to vector<4x32x1xf32>
    %25 = arith.addf %24, %23 : vector<4x32x1xf32>
    %26 = arith.divf %24, %25 : vector<4x32x1xf32>
    %27 = vector.broadcast %26 : vector<4x32x1xf32> to vector<4x32x13xf32>
    %28 = arith.mulf %27, %12 : vector<4x32x13xf32>
    %29 = vector.shape_cast %10 : vector<32x13xf32> to vector<1x32x13xf32>
    %30 = vector.broadcast %29 : vector<1x32x13xf32> to vector<4x32x13xf32>
    %31 = arith.addf %28, %30 : vector<4x32x13xf32>
    %32 = vector.shape_cast %31 : vector<4x32x13xf32> to vector<128x13xf32>
    %33 = arith.truncf %32 : vector<128x13xf32> to vector<128x13xbf16>
    %c0_14 = arith.constant 0 : index
    %c0_15 = arith.constant 0 : index
    %34 = vector.load %arg7[%c0_14, %c0_15] : memref<13x16xbf16, #tpu.memory_space<vmem>>, vector<13x16xbf16>
    %cst_16 = arith.constant dense<0.000000e+00> : vector<128x16xf32>
    %35 = tpu.matmul %33, %34, %cst_16 {dimension_numbers = #tpu.dot_dimension_numbers<[1], [0], [0], [1], [0, 0, 1, 1], [], []>} : vector<128x13xbf16>, vector<13x16xbf16>, vector<128x16xf32> -> vector<128x16xf32>
    %c0_17 = arith.constant 0 : index
    %c0_18 = arith.constant 0 : index
    %36 = vector.load %arg8[%c0_17, %c0_18] : memref<1x16xf32, #tpu.memory_space<vmem>>, vector<1x16xf32>
    %37 = vector.broadcast %36 : vector<1x16xf32> to vector<128x16xf32>
    %38 = arith.addf %35, %37 : vector<128x16xf32>
    %cst_19 = arith.constant 0.000000e+00 : f32
    %39 = vector.broadcast %cst_19 : f32 to vector<128x16xf32>
    %40 = arith.cmpf oge, %38, %39 : vector<128x16xf32>
    %cst_20 = arith.constant 2.000000e-02 : f32
    %41 = vector.broadcast %cst_20 : f32 to vector<128x16xf32>
    %42 = arith.mulf %41, %38 : vector<128x16xf32>
    %43 = arith.select %40, %38, %42 : vector<128x16xi1>, vector<128x16xf32>
    %44 = vector.shape_cast %43 : vector<128x16xf32> to vector<4x32x16xf32>
    %cst_21 = arith.constant dense<0.000000e+00> : vector<32x16xf32>
    %45 = vector.multi_reduction <add>, %44, %cst_21 [0] : vector<4x32x16xf32> to vector<32x16xf32>
    %cst_22 = arith.constant 4.000000e+00 : f32
    %46 = vector.broadcast %cst_22 : f32 to vector<32x16xf32>
    %47 = arith.divf %45, %46 : vector<32x16xf32>
    %c0_23 = arith.constant 0 : index
    %c0_24 = arith.constant 0 : index
    %48 = vector.load %arg9[%c0_23, %c0_24] : memref<32x16xf32, #tpu.memory_space<vmem>>, vector<32x16xf32>
    tpu.vector_store %arg9[%c0_23, %c0_24], %47 {strides = array<i32>} : memref<32x16xf32, #tpu.memory_space<vmem>>, vector<32x16xf32>,
    return
  }
  func.func @transform_0(%arg0: i32) -> (i32, i32) {
    %c0_i32 = arith.constant 0 : i32
    %c0_i32_0 = arith.constant 0 : i32
    return %arg0, %c0_i32 : i32, i32
  }
  func.func @transform_1(%arg0: i32) -> (i32, i32, i32) {
    %c0_i32 = arith.constant 0 : i32
    %c0_i32_0 = arith.constant 0 : i32
    %c0_i32_1 = arith.constant 0 : i32
    return %c0_i32, %arg0, %c0_i32_0 : i32, i32, i32
  }
  func.func @transform_2(%arg0: i32) -> (i32, i32) {
    %c0_i32 = arith.constant 0 : i32
    %c0_i32_0 = arith.constant 0 : i32
    %c0_i32_1 = arith.constant 0 : i32
    return %c0_i32, %c0_i32_0 : i32, i32
  }
  func.func @transform_3(%arg0: i32) -> (i32, i32) {
    %c0_i32 = arith.constant 0 : i32
    %c0_i32_0 = arith.constant 0 : i32
    %c0_i32_1 = arith.constant 0 : i32
    return %c0_i32, %c0_i32_0 : i32, i32
  }
  func.func @transform_4(%arg0: i32) -> (i32, i32) {
    %c0_i32 = arith.constant 0 : i32
    %c0_i32_0 = arith.constant 0 : i32
    %c0_i32_1 = arith.constant 0 : i32
    return %c0_i32, %c0_i32_0 : i32, i32
  }
  func.func @transform_5(%arg0: i32) -> (i32, i32) {
    %c0_i32 = arith.constant 0 : i32
    %c0_i32_0 = arith.constant 0 : i32
    %c0_i32_1 = arith.constant 0 : i32
    return %c0_i32, %c0_i32_0 : i32, i32
  }
  func.func @transform_6(%arg0: i32) -> (i32, i32) {
    %c0_i32 = arith.constant 0 : i32
    %c0_i32_0 = arith.constant 0 : i32
    %c0_i32_1 = arith.constant 0 : i32
    return %c0_i32, %c0_i32_0 : i32, i32
  }
  func.func @transform_7(%arg0: i32) -> (i32, i32) {
    %c0_i32 = arith.constant 0 : i32
    %c0_i32_0 = arith.constant 0 : i32
    %c0_i32_1 = arith.constant 0 : i32
    return %c0_i32, %c0_i32_0 : i32, i32
  }
  func.func @transform_8(%arg0: i32) -> (i32, i32) {
    %c0_i32 = arith.constant 0 : i32
    %c0_i32_0 = arith.constant 0 : i32
    return %arg0, %c0_i32 : i32, i32
  }
}

module attributes {stable_mosaic.version = 11 : i64} {
  func.func @head_kernel(%arg0: memref<2x24xf32, #tpu.memory_space<vmem>>, %arg1: memref<24x24xf32, #tpu.memory_space<vmem>>, %arg2: memref<1x24xf32, #tpu.memory_space<vmem>>, %arg3: memref<24x32xf32, #tpu.memory_space<vmem>>, %arg4: memref<24x32xf32, #tpu.memory_space<vmem>>, %arg5: memref<1x32xf32, #tpu.memory_space<vmem>>, %arg6: memref<32x32xf32, #tpu.memory_space<vmem>>, %arg7: memref<1x32xf32, #tpu.memory_space<vmem>>, %arg8: memref<32x32xf32, #tpu.memory_space<vmem>>, %arg9: memref<1x32xf32, #tpu.memory_space<vmem>>, %arg10: memref<32x16xf32, #tpu.memory_space<vmem>>, %arg11: memref<32x16xf32, #tpu.memory_space<vmem>>, %arg12: memref<1x16xf32, #tpu.memory_space<vmem>>, %arg13: memref<16x16xf32, #tpu.memory_space<vmem>>, %arg14: memref<1x16xf32, #tpu.memory_space<vmem>>, %arg15: memref<16x16xf32, #tpu.memory_space<vmem>>, %arg16: memref<1x16xf32, #tpu.memory_space<vmem>>, %arg17: memref<16x4xf32, #tpu.memory_space<vmem>>, %arg18: memref<1x4xf32, #tpu.memory_space<vmem>>, %arg19: memref<2x4xf32, #tpu.memory_space<vmem>>) attributes {dimension_semantics = [], scalar_prefetch = 0 : i64, scratch_operands = 0 : i64, tpu.core_type = #tpu.core_type<tc>} {
    %c0 = arith.constant 0 : index
    %c0_0 = arith.constant 0 : index
    %0 = vector.load %arg0[%c0, %c0_0] : memref<2x24xf32, #tpu.memory_space<vmem>>, vector<2x24xf32>
    %c0_1 = arith.constant 0 : index
    %c0_2 = arith.constant 0 : index
    %1 = vector.load %arg1[%c0_1, %c0_2] : memref<24x24xf32, #tpu.memory_space<vmem>>, vector<24x24xf32>
    %cst = arith.constant dense<0.000000e+00> : vector<2x24xf32>
    %2 = tpu.matmul %0, %1, %cst {dimension_numbers = #tpu.dot_dimension_numbers<[1], [0], [0], [1], [0, 0, 1, 1], [], []>} : vector<2x24xf32>, vector<24x24xf32>, vector<2x24xf32> -> vector<2x24xf32>
    %c0_3 = arith.constant 0 : index
    %c0_4 = arith.constant 0 : index
    %3 = vector.load %arg2[%c0_3, %c0_4] : memref<1x24xf32, #tpu.memory_space<vmem>>, vector<1x24xf32>
    %4 = vector.broadcast %3 : vector<1x24xf32> to vector<2x24xf32>
    %5 = arith.addf %2, %4 : vector<2x24xf32>
    %cst_5 = arith.constant 0.000000e+00 : f32
    %6 = vector.broadcast %cst_5 : f32 to vector<2x24xf32>
    %7 = arith.cmpf oge, %5, %6 : vector<2x24xf32>
    %cst_6 = arith.constant 2.000000e-01 : f32
    %8 = vector.broadcast %cst_6 : f32 to vector<2x24xf32>
    %9 = arith.mulf %8, %5 : vector<2x24xf32>
    %10 = arith.select %7, %5, %9 : vector<2x24xi1>, vector<2x24xf32>
    %c0_7 = arith.constant 0 : index
    %c0_8 = arith.constant 0 : index
    %11 = vector.load %arg3[%c0_7, %c0_8] : memref<24x32xf32, #tpu.memory_space<vmem>>, vector<24x32xf32>
    %c0_9 = arith.constant 0 : index
    %c0_10 = arith.constant 0 : index
    %12 = vector.load %arg4[%c0_9, %c0_10] : memref<24x32xf32, #tpu.memory_space<vmem>>, vector<24x32xf32>
    %c0_11 = arith.constant 0 : index
    %c0_12 = arith.constant 0 : index
    %13 = vector.load %arg5[%c0_11, %c0_12] : memref<1x32xf32, #tpu.memory_space<vmem>>, vector<1x32xf32>
    %c0_13 = arith.constant 0 : index
    %c0_14 = arith.constant 0 : index
    %14 = vector.load %arg6[%c0_13, %c0_14] : memref<32x32xf32, #tpu.memory_space<vmem>>, vector<32x32xf32>
    %c0_15 = arith.constant 0 : index
    %c0_16 = arith.constant 0 : index
    %15 = vector.load %arg7[%c0_15, %c0_16] : memref<1x32xf32, #tpu.memory_space<vmem>>, vector<1x32xf32>
    %c0_17 = arith.constant 0 : index
    %c0_18 = arith.constant 0 : index
    %16 = vector.load %arg8[%c0_17, %c0_18] : memref<32x32xf32, #tpu.memory_space<vmem>>, vector<32x32xf32>
    %c0_19 = arith.constant 0 : index
    %c0_20 = arith.constant 0 : index
    %17 = vector.load %arg9[%c0_19, %c0_20] : memref<1x32xf32, #tpu.memory_space<vmem>>, vector<1x32xf32>
    %cst_21 = arith.constant dense<0.000000e+00> : vector<2x32xf32>
    %18 = tpu.matmul %10, %11, %cst_21 {dimension_numbers = #tpu.dot_dimension_numbers<[1], [0], [0], [1], [0, 0, 1, 1], [], []>} : vector<2x24xf32>, vector<24x32xf32>, vector<2x32xf32> -> vector<2x32xf32>
    %cst_22 = arith.constant dense<0.000000e+00> : vector<2x32xf32>
    %19 = tpu.matmul %10, %12, %cst_22 {dimension_numbers = #tpu.dot_dimension_numbers<[1], [0], [0], [1], [0, 0, 1, 1], [], []>} : vector<2x24xf32>, vector<24x32xf32>, vector<2x32xf32> -> vector<2x32xf32>
    %20 = vector.broadcast %13 : vector<1x32xf32> to vector<2x32xf32>
    %21 = arith.addf %19, %20 : vector<2x32xf32>
    %cst_23 = arith.constant 0.000000e+00 : f32
    %22 = vector.broadcast %cst_23 : f32 to vector<2x32xf32>
    %23 = arith.cmpf oge, %21, %22 : vector<2x32xf32>
    %cst_24 = arith.constant 2.000000e-01 : f32
    %24 = vector.broadcast %cst_24 : f32 to vector<2x32xf32>
    %25 = arith.mulf %24, %21 : vector<2x32xf32>
    %26 = arith.select %23, %21, %25 : vector<2x32xi1>, vector<2x32xf32>
    %cst_25 = arith.constant dense<0.000000e+00> : vector<2x32xf32>
    %27 = tpu.matmul %26, %14, %cst_25 {dimension_numbers = #tpu.dot_dimension_numbers<[1], [0], [0], [1], [0, 0, 1, 1], [], []>} : vector<2x32xf32>, vector<32x32xf32>, vector<2x32xf32> -> vector<2x32xf32>
    %28 = vector.broadcast %15 : vector<1x32xf32> to vector<2x32xf32>
    %29 = arith.addf %27, %28 : vector<2x32xf32>
    %cst_26 = arith.constant 0.000000e+00 : f32
    %30 = vector.broadcast %cst_26 : f32 to vector<2x32xf32>
    %31 = arith.cmpf oge, %29, %30 : vector<2x32xf32>
    %cst_27 = arith.constant 2.000000e-01 : f32
    %32 = vector.broadcast %cst_27 : f32 to vector<2x32xf32>
    %33 = arith.mulf %32, %29 : vector<2x32xf32>
    %34 = arith.select %31, %29, %33 : vector<2x32xi1>, vector<2x32xf32>
    %cst_28 = arith.constant dense<0.000000e+00> : vector<2x32xf32>
    %35 = tpu.matmul %34, %16, %cst_28 {dimension_numbers = #tpu.dot_dimension_numbers<[1], [0], [0], [1], [0, 0, 1, 1], [], []>} : vector<2x32xf32>, vector<32x32xf32>, vector<2x32xf32> -> vector<2x32xf32>
    %36 = vector.broadcast %17 : vector<1x32xf32> to vector<2x32xf32>
    %37 = arith.addf %35, %36 : vector<2x32xf32>
    %38 = arith.addf %37, %18 : vector<2x32xf32>
    %c0_29 = arith.constant 0 : index
    %c0_30 = arith.constant 0 : index
    %39 = vector.load %arg10[%c0_29, %c0_30] : memref<32x16xf32, #tpu.memory_space<vmem>>, vector<32x16xf32>
    %c0_31 = arith.constant 0 : index
    %c0_32 = arith.constant 0 : index
    %40 = vector.load %arg11[%c0_31, %c0_32] : memref<32x16xf32, #tpu.memory_space<vmem>>, vector<32x16xf32>
    %c0_33 = arith.constant 0 : index
    %c0_34 = arith.constant 0 : index
    %41 = vector.load %arg12[%c0_33, %c0_34] : memref<1x16xf32, #tpu.memory_space<vmem>>, vector<1x16xf32>
    %c0_35 = arith.constant 0 : index
    %c0_36 = arith.constant 0 : index
    %42 = vector.load %arg13[%c0_35, %c0_36] : memref<16x16xf32, #tpu.memory_space<vmem>>, vector<16x16xf32>
    %c0_37 = arith.constant 0 : index
    %c0_38 = arith.constant 0 : index
    %43 = vector.load %arg14[%c0_37, %c0_38] : memref<1x16xf32, #tpu.memory_space<vmem>>, vector<1x16xf32>
    %c0_39 = arith.constant 0 : index
    %c0_40 = arith.constant 0 : index
    %44 = vector.load %arg15[%c0_39, %c0_40] : memref<16x16xf32, #tpu.memory_space<vmem>>, vector<16x16xf32>
    %c0_41 = arith.constant 0 : index
    %c0_42 = arith.constant 0 : index
    %45 = vector.load %arg16[%c0_41, %c0_42] : memref<1x16xf32, #tpu.memory_space<vmem>>, vector<1x16xf32>
    %cst_43 = arith.constant dense<0.000000e+00> : vector<2x16xf32>
    %46 = tpu.matmul %38, %39, %cst_43 {dimension_numbers = #tpu.dot_dimension_numbers<[1], [0], [0], [1], [0, 0, 1, 1], [], []>} : vector<2x32xf32>, vector<32x16xf32>, vector<2x16xf32> -> vector<2x16xf32>
    %cst_44 = arith.constant dense<0.000000e+00> : vector<2x16xf32>
    %47 = tpu.matmul %38, %40, %cst_44 {dimension_numbers = #tpu.dot_dimension_numbers<[1], [0], [0], [1], [0, 0, 1, 1], [], []>} : vector<2x32xf32>, vector<32x16xf32>, vector<2x16xf32> -> vector<2x16xf32>
    %48 = vector.broadcast %41 : vector<1x16xf32> to vector<2x16xf32>
    %49 = arith.addf %47, %48 : vector<2x16xf32>
    %cst_45 = arith.constant 0.000000e+00 : f32
    %50 = vector.broadcast %cst_45 : f32 to vector<2x16xf32>
    %51 = arith.cmpf oge, %49, %50 : vector<2x16xf32>
    %cst_46 = arith.constant 2.000000e-01 : f32
    %52 = vector.broadcast %cst_46 : f32 to vector<2x16xf32>
    %53 = arith.mulf %52, %49 : vector<2x16xf32>
    %54 = arith.select %51, %49, %53 : vector<2x16xi1>, vector<2x16xf32>
    %cst_47 = arith.constant dense<0.000000e+00> : vector<2x16xf32>
    %55 = tpu.matmul %54, %42, %cst_47 {dimension_numbers = #tpu.dot_dimension_numbers<[1], [0], [0], [1], [0, 0, 1, 1], [], []>} : vector<2x16xf32>, vector<16x16xf32>, vector<2x16xf32> -> vector<2x16xf32>
    %56 = vector.broadcast %43 : vector<1x16xf32> to vector<2x16xf32>
    %57 = arith.addf %55, %56 : vector<2x16xf32>
    %cst_48 = arith.constant 0.000000e+00 : f32
    %58 = vector.broadcast %cst_48 : f32 to vector<2x16xf32>
    %59 = arith.cmpf oge, %57, %58 : vector<2x16xf32>
    %cst_49 = arith.constant 2.000000e-01 : f32
    %60 = vector.broadcast %cst_49 : f32 to vector<2x16xf32>
    %61 = arith.mulf %60, %57 : vector<2x16xf32>
    %62 = arith.select %59, %57, %61 : vector<2x16xi1>, vector<2x16xf32>
    %cst_50 = arith.constant dense<0.000000e+00> : vector<2x16xf32>
    %63 = tpu.matmul %62, %44, %cst_50 {dimension_numbers = #tpu.dot_dimension_numbers<[1], [0], [0], [1], [0, 0, 1, 1], [], []>} : vector<2x16xf32>, vector<16x16xf32>, vector<2x16xf32> -> vector<2x16xf32>
    %64 = vector.broadcast %45 : vector<1x16xf32> to vector<2x16xf32>
    %65 = arith.addf %63, %64 : vector<2x16xf32>
    %66 = arith.addf %65, %46 : vector<2x16xf32>
    %c0_51 = arith.constant 0 : index
    %c0_52 = arith.constant 0 : index
    %67 = vector.load %arg17[%c0_51, %c0_52] : memref<16x4xf32, #tpu.memory_space<vmem>>, vector<16x4xf32>
    %cst_53 = arith.constant dense<0.000000e+00> : vector<2x4xf32>
    %68 = tpu.matmul %66, %67, %cst_53 {dimension_numbers = #tpu.dot_dimension_numbers<[1], [0], [0], [1], [0, 0, 1, 1], [], []>} : vector<2x16xf32>, vector<16x4xf32>, vector<2x4xf32> -> vector<2x4xf32>
    %c0_54 = arith.constant 0 : index
    %c0_55 = arith.constant 0 : index
    %69 = vector.load %arg18[%c0_54, %c0_55] : memref<1x4xf32, #tpu.memory_space<vmem>>, vector<1x4xf32>
    %70 = vector.broadcast %69 : vector<1x4xf32> to vector<2x4xf32>
    %71 = arith.addf %68, %70 : vector<2x4xf32>
    %cst_56 = arith.constant dense<0xFF800000> : vector<2xf32>
    %72 = vector.multi_reduction <maximumf>, %71, %cst_56 [1] : vector<2x4xf32> to vector<2xf32>
    %73 = vector.shape_cast %72 : vector<2xf32> to vector<2x1xf32>
    %74 = vector.broadcast %73 : vector<2x1xf32> to vector<2x4xf32>
    %75 = arith.subf %71, %74 : vector<2x4xf32>
    %76 = math.exp %75 : vector<2x4xf32>
    %cst_57 = arith.constant dense<0.000000e+00> : vector<2xf32>
    %77 = vector.multi_reduction <add>, %76, %cst_57 [1] : vector<2x4xf32> to vector<2xf32>
    %78 = vector.shape_cast %77 : vector<2xf32> to vector<2x1xf32>
    %79 = vector.broadcast %78 : vector<2x1xf32> to vector<2x4xf32>
    %80 = arith.divf %76, %79 : vector<2x4xf32>
    %c0_58 = arith.constant 0 : index
    %c0_59 = arith.constant 0 : index
    %81 = vector.load %arg19[%c0_58, %c0_59] : memref<2x4xf32, #tpu.memory_space<vmem>>, vector<2x4xf32>
    tpu.vector_store %arg19[%c0_58, %c0_59], %80 {strides = array<i32>} : memref<2x4xf32, #tpu.memory_space<vmem>>, vector<2x4xf32>,
    return
  }
}

</mosaic_0001>

<bundles_post_ra>
// kernel: sub.25
= control target key start
LH: loop header
LB: loop body
LE: loop exit
PB: predicated region body
PF: predicated region fallthrough
CT: control target
= control target key end

     0   :  { %vm8_vm0 = vcmask 130048   ;;  %s42_s0 = inlined_call_operand.vmem [shape: f32[32], index: 0, kind: input, shape index: {}]   ;;  %s43_s1 = inlined_call_operand.vmem [shape: f32[2,16], index: 1, kind: output, shape index: {}]  }
   0x1   :  { %v5_v0 = vld [vmem:[%s42_s0] sm:$0x1]  ;;  %s25_s0 = smov 112  }
   0x2   :  { %6 = vst [vmem:[#allocation1] sm:$0x1] %v5_v0 }
   0x9   :  { %v10_v1 = vld [vmem:[#allocation1] sm:$0x1]  }
   0xa   :  { %v7_v2 = vld [vmem:[#allocation1] sm:$0x1]   ;;  %11 = vrot.lane.b32.xlu0 %v10_v1, %s25_s0 }
   0xb   :  { %9 = vst.msk [vmem:[#allocation0] sm:$0x1] %vm8_vm0, %v7_v2  }
  0x7c   :  { %v12_v3 = vpop.permute.xlu0 %11  }
  0x7d   :  { %15 = vst.msk [vmem:[#allocation0 + $0x1] sm:$0x1] %vm8_vm0, %v12_v3  }
  0x84   :  { %v20_v4 = vld [vmem:[#allocation0] sm:$0x3] }
  0x85   :  { %23 = vst [vmem:[%s43_s1] sm:$0x3] %v20_v4 }

// kernel: _lambda_.3
= control target key start
LH: loop header
LB: loop body
LE: loop exit
PB: predicated region body
PF: predicated region fallthrough
CT: control target
= control target key end

     0   :  { %vm63_vm0 = vcmask 1041408   ;;  %vm64_vm1 = vcmask 1042432   ;;  %vm56_vm2 = vcmask 39936   ;;  %v875_v3 = vmov 65535   ;;  %s1164_s4 = inlined_call_operand.<no memory space> [shape: f32[1,1], index: 4, kind: input, shape index: {}]   ;;  %s1165_s5 = inlined_call_operand.<no memory space> [shape: f32[1,1], index: 5, kind: input, shape index: {}]   ;;  %s1166_s2 = inlined_call_operand.vmem [shape: bf16[5,10], index: 2, kind: input, shape index: {}]   ;;  %s1167_s0 = inlined_call_operand.vmem [shape: bf16[32,5], index: 0, kind: input, shape index: {}]   ;;  %s1168_s1 = inlined_call_operand.vmem [shape: bf16[4,32,10], index: 1, kind: input, shape index: {}]   ;;  %s1169_s6 = inlined_call_operand.vmem [shape: bf16[10,8], index: 6, kind: input, shape index: {}]   ;;  %s1170_s3 = inlined_call_operand.vmem [shape: f32[1,10], index: 3, kind: input, shape index: {}]   ;;  %s1171_s7 = inlined_call_operand.vmem [shape: f32[1,8], index: 7, kind: input, shape index: {}]   ;;  %s1172_s8 = inlined_call_operand.vmem [shape: f32[32,8], index: 8, kind: output, shape index: {}]  }
   0x1   :  { %v13_v0 = vstv %s1164_s4  ;;  %v15_v1 = vstv %s1165_s5  ;;  %v38_v2 = vld [vmem:[%s1166_s2] sm:$0x7]  ;;  %v65_v4 = vsel %vm63_vm0, 4294967295, %v875_v3  ;;  %v876_v7 = vmov 9   ;;  %v793_v9 = vld [vmem:[%s1167_s0 + $0x8] sm:$0xff]   ;;  %s877_s2 = smov 9  }
   0x2   :  { %14 = vst [vmem:[#allocation2] sm:$0x1] %v13_v0  ;;  %16 = vst [vmem:[#allocation3] sm:$0x1] %v15_v1  ;;  %v66_v5 = vsel %vm64_vm1, %v65_v4, 0  ;;  %v792_v6 = vld [vmem:[%s1167_s0] sm:$0xff]   ;;  %791 = vset.pattern.permute.xlu0 %v876_v7  ;;  %790 = vset.pattern.permute.xlu1 %v876_v7 }
   0x3   :  { %v68_v8 = vand.u32 %v66_v5, %v38_v2  ;;  %761 = vmatprep.mubr.msk.bf16.mxu0 %vm56_vm2, %v792_v6  ;;  %v943_v12 = vld [vmem:[%s1168_s1 + $0x18] sm:$0xff]   ;;  %v948_v13 = vld [vmem:[%s1168_s1 + $0x10] sm:$0xff]   ;;  %v953_v14 = vld [vmem:[%s1168_s1 + $0x20] sm:$0xff]   ;;  %vm480_vm3 = vcmask 1044480   ;;  %vm455_vm4 = vcmask 80896   ;;  %vm629_vm10 = vcmask 64512  }
   0x4   :  { %v958_v15 = vld [vmem:[%s1168_s1 + $0x28] sm:$0xff]   ;;  %v722_v16 = vunpack.c.l.bf16 %v943_v12  ;;  %v718_v17 = vunpack.c.l.bf16 %v948_v13  ;;  %v719_v18 = vunpack.c.h.bf16 %v948_v13  ;;  %v727_v19 = vunpack.c.h.bf16 %v953_v14  ;;  %v967_v20 = vld [vmem:[%s1168_s1] sm:$0xff]   ;;  %v1010_v41 = vld [vmem:[%s1168_s1 + $0x30] sm:$0xff]  }
   0x5   :  { %759 = vmatprep.subr.bf16.mxu0 %v68_v8  ;;  %v731_v22 = vunpack.c.h.bf16 %v958_v15  ;;  %v723_v23 = vunpack.c.h.bf16 %v943_v12  ;;  %v711_v24 = vunpack.c.h.bf16 %v967_v20  ;;  %v989_v29 = vld [vmem:[%s1168_s1 + $0x8] sm:$0xff]   ;;  %v726_v33 = vunpack.c.l.bf16 %v953_v14  ;;  %v1024_v52 = vld [vmem:[%s1168_s1 + $0x38] sm:$0xff]  }
   0x6   :  { %760 = vmatpush3.bf16.msra.mxu0 %v68_v8  ;;  %v715_v40 = vunpack.c.h.bf16 %v989_v29  ;;  %v730_v48 = vunpack.c.l.bf16 %v958_v15  ;;  %v735_v51 = vunpack.c.h.bf16 %v1010_v41  ;;  %v710_v55 = vunpack.c.l.bf16 %v967_v20 }
   0x7   :  { %v739_v58 = vunpack.c.h.bf16 %v1024_v52  ;;  %v714_v59 = vunpack.c.l.bf16 %v989_v29  ;;  %v734_v8 = vunpack.c.l.bf16 %v1010_v41 }
   0x9   :  { %v680_v10 = vld [vmem:[#allocation2] ss:$0 sm:$0xff]  ;;  %762 = vmatmul.mubr.msk.bf16.vlgmr.msra.gmra.mxu0 %vm56_vm2, %v793_v9  ;;  %v681_v11 = vld [vmem:[#allocation3] ss:$0 sm:$0xff] }
   0xa   :  { %181 = vrot.lane.b32.xlu0 %v680_v10, %s877_s2 }
   0xe   :  { %206 = vrot.lane.b32.xlu0 %v681_v11, %s877_s2 }
  0x7c   :  { %v969_v21 = vpop.permute.xlu0 %181 }
  0x7d   :  { %v190_v25 = vmul.f32 %v722_v16, %v969_v21  ;;  %v188_v26 = vmul.f32 %v718_v17, %v969_v21  ;;  %v189_v27 = vmul.f32 %v719_v18, %v969_v21  ;;  %v193_v28 = vmul.f32 %v727_v19, %v969_v21 }
  0x7e   :  { %v195_v31 = vmul.f32 %v731_v22, %v969_v21  ;;  %v191_v32 = vmul.f32 %v723_v23, %v969_v21  ;;  %v185_v45 = vmul.f32 %v711_v24, %v969_v21  ;;  %v192_v47 = vmul.f32 %v726_v33, %v969_v21 }
  0x7f   :  { %v187_v56 = vmul.f32 %v715_v40, %v969_v21  ;;  %v194_v57 = vmul.f32 %v730_v48, %v969_v21  ;;  %v197_v62 = vmul.f32 %v735_v51, %v969_v21  ;;  %v184_v1 = vmul.f32 %v710_v55, %v969_v21 }
  0x80   :  { %v991_v30 = vpop.permute.xlu0 %206  ;;  %v199_v5 = vmul.f32 %v739_v58, %v969_v21  ;;  %v186_v7 = vmul.f32 %v714_v59, %v969_v21 }
  0x81   :  { %v215_v34 = vadd.f32 %v991_v30, %v190_v25  ;;  %v213_v35 = vadd.f32 %v991_v30, %v188_v26  ;;  %v214_v36 = vadd.f32 %v991_v30, %v189_v27  ;;  %v218_v37 = vadd.f32 %v991_v30, %v193_v28 }
  0x82   :  { %v220_v38 = vadd.f32 %v991_v30, %v195_v31  ;;  %v216_v39 = vadd.f32 %v991_v30, %v191_v32  ;;  %v210_v50 = vadd.f32 %v991_v30, %v185_v45  ;;  %v217_v54 = vadd.f32 %v991_v30, %v192_v47 }
  0x83   :  { %v688_v42 = vmul.f32 -1.442695, %v215_v34  ;;  %v686_v43 = vmul.f32 -1.442695, %v213_v35  ;;  %v687_v44 = vmul.f32 -1.442695, %v214_v36  ;;  %v212_v61 = vadd.f32 %v991_v30, %v187_v56 }
  0x84   :  { %v691_v46 = vmul.f32 -1.442695, %v218_v37  ;;  %v693_v49 = vmul.f32 -1.442695, %v220_v38  ;;  %v689_v53 = vmul.f32 -1.442695, %v216_v39  ;;  %v219_v0 = vadd.f32 %v991_v30, %v194_v57 }
  0x85   :  { %795 = vpow2.f32 %v688_v42  ;;  %v683_v60 = vmul.f32 -1.442695, %v210_v50  ;;  %v690_v63 = vmul.f32 -1.442695, %v217_v54  ;;  %v222_v2 = vadd.f32 %v991_v30, %v197_v62 }
  0x86   :  { %797 = vpow2.f32 %v686_v43  ;;  %v209_v3 = vadd.f32 %v991_v30, %v184_v1  ;;  %v685_v4 = vmul.f32 -1.442695, %v212_v61  ;;  %v692_v6 = vmul.f32 -1.442695, %v219_v0 }
  0x87   :  { %799 = vpow2.f32 %v687_v44  ;;  %v695_v9 = vmul.f32 -1.442695, %v222_v2  ;;  %v224_v10 = vadd.f32 %v991_v30, %v199_v5  ;;  %v211_v25 = vadd.f32 %v991_v30, %v186_v7 }
  0x88   :  { %801 = vpow2.f32 %v691_v46  ;;  %v682_v11 = vmul.f32 -1.442695, %v209_v3  ;;  %v196_v27 = vmul.f32 %v734_v8, %v969_v21  ;;  %v738_v28 = vunpack.c.l.bf16 %v1024_v52 }
  0x89   :  { %803 = vpow2.f32 %v693_v49  ;;  %v697_v34 = vmul.f32 -1.442695, %v224_v10  ;;  %v684_v37 = vmul.f32 -1.442695, %v211_v25 }
  0x8a   :  { %805 = vpow2.f32 %v689_v53  ;;  %v221_v38 = vadd.f32 %v991_v30, %v196_v27  ;;  %v198_v45 = vmul.f32 %v738_v28, %v969_v21 }
  0x8b   :  { %807 = vpow2.f32 %v683_v60 }
  0x8c   :  { %809 = vpow2.f32 %v690_v63  ;;  %v694_v47 = vmul.f32 -1.442695, %v221_v38  ;;  %v223_v49 = vadd.f32 %v991_v30, %v198_v45 }
  0x8d   :  { %811 = vpow2.f32 %v685_v4 }
  0x8e   :  { %813 = vpow2.f32 %v692_v6  ;;  %v696_v57 = vmul.f32 -1.442695, %v223_v49 }
  0x8f   :  { %815 = vpow2.f32 %v695_v9 }
  0x90   :  { %817 = vpow2.f32 %v682_v11 }
  0x92   :  { %v796_v26 = vpop.eup %795 }
  0x93   :  { %v798_v31 = vpop.eup %797  ;;  %v279_v32 = vadd.f32 1.0, %v796_v26 }
  0x94   :  { %v800_v35 = vpop.eup %799  ;;  %v277_v36 = vadd.f32 1.0, %v798_v31 }
  0x95   :  { %v802_v39 = vpop.eup %801  ;;  %819 = vrcp.f32 %v279_v32  ;;  %v278_v44 = vadd.f32 1.0, %v800_v35 }
  0x96   :  { %v804_v42 = vpop.eup %803  ;;  %821 = vrcp.f32 %v277_v36  ;;  %v282_v43 = vadd.f32 1.0, %v802_v39 }
  0x97   :  { %v806_v46 = vpop.eup %805  ;;  %823 = vpow2.f32 %v697_v34  ;;  %v284_v50 = vadd.f32 1.0, %v804_v42  ;;  %v794_v34 = vld [vmem:[%s1169_s6] sm:$0x1f]  }
  0x98   :  { %825 = vpow2.f32 %v684_v37  ;;  %v808_v53 = vpop.eup %807  ;;  %v280_v54 = vadd.f32 1.0, %v806_v46  ;;  %786 = vmatprep.subr.msk.bf16.mxu1 %vm480_vm3, %v794_v34  ;;  %v482_v38 = vsel %vm480_vm3, %v794_v34, 0  ;;  %785 = vmatprep.subr.msk.bf16.mxu0 %vm480_vm3, %v794_v34 }
  0x99   :  { %827 = vrcp.f32 %v282_v43  ;;  %v810_v56 = vpop.eup %809  ;;  %v274_v60 = vadd.f32 1.0, %v808_v53  ;;  %784 = vmatpush3.bf16.msra.mxu1 %v482_v38  ;;  %766 = vmatpush3.bf16.msra.mxu0 %v482_v38 }
  0x9a   :  { %829 = vrcp.f32 %v278_v44  ;;  %v812_v61 = vpop.eup %811  ;;  %v281_v62 = vadd.f32 1.0, %v810_v56 }
  0x9b   :  { %831 = vpow2.f32 %v694_v47  ;;  %v814_v21 = vpop.eup %813  ;;  %v276_v1 = vadd.f32 1.0, %v812_v61 }
  0x9c   :  { %833 = vrcp.f32 %v284_v50  ;;  %v816_v63 = vpop.eup %815  ;;  %v283_v2 = vadd.f32 1.0, %v814_v21 }
  0x9d   :  { %835 = vrcp.f32 %v280_v54  ;;  %v818_v0 = vpop.eup %817  ;;  %v286_v6 = vadd.f32 1.0, %v816_v63 }
  0x9e   :  { %837 = vpow2.f32 %v696_v57  ;;  %v273_v9 = vadd.f32 1.0, %v818_v0  ;;  %v671_v57 = vld [vmem:[%s1170_s3] ss:$0 sm:$0xff] }
  0x9f   :  { %839 = vrcp.f32 %v274_v60 }
  0xa0   :  { %841 = vrcp.f32 %v281_v62 }
  0xa1   :  { %843 = vrcp.f32 %v276_v1 }
  0xa2   :  { %v820_v30 = vpop.eup %819  ;;  %845 = vrcp.f32 %v283_v2 }
  0xa3   :  { %v822_v3 = vpop.eup %821  ;;  %353 = vperm.xlu0 %791, %v820_v30   ;;  %847 = vrcp.f32 %v286_v6 }
  0xa4   :  { %v824_v4 = vpop.eup %823  ;;  %343 = vperm.xlu1 %790, %v822_v3   ;;  %849 = vrcp.f32 %v273_v9 }
  0xa5   :  { %v826_v5 = vpop.eup %825  ;;  %v288_v25 = vadd.f32 1.0, %v824_v4 }
  0xa6   :  { %v828_v7 = vpop.eup %827  ;;  %v275_v27 = vadd.f32 1.0, %v826_v5 }
  0xa7   :  { %v830_v10 = vpop.eup %829  ;;  %368 = vperm.xlu0 %791, %v828_v7   ;;  %851 = vrcp.f32 %v288_v25 }
  0xa8   :  { %348 = vperm.xlu1 %790, %v830_v10   ;;  %v832_v11 = vpop.eup %831  ;;  %853 = vrcp.f32 %v275_v27 }
  0xa9   :  { %v834_v26 = vpop.eup %833  ;;  %v285_v36 = vadd.f32 1.0, %v832_v11 }
  0xaa   :  { %v836_v31 = vpop.eup %835 }
  0xab   :  { %378 = vperm.xlu0 %791, %v834_v26   ;;  %v838_v32 = vpop.eup %837  ;;  %855 = vrcp.f32 %v285_v36 }
  0xac   :  { %358 = vperm.xlu1 %790, %v836_v31   ;;  %v840_v35 = vpop.eup %839  ;;  %v287_v42 = vadd.f32 1.0, %v838_v32 }
  0xad   :  { %v842_v37 = vpop.eup %841 }
  0xae   :  { %v844_v39 = vpop.eup %843  ;;  %857 = vrcp.f32 %v287_v42 }
  0xaf   :  { %328 = vperm.xlu0 %791, %v840_v35   ;;  %v846_v43 = vpop.eup %845 }
  0xb0   :  { %363 = vperm.xlu1 %790, %v842_v37   ;;  %v848_v44 = vpop.eup %847 }
  0xb1   :  { %v850_v45 = vpop.eup %849 }
  0xb3   :  { %338 = vperm.xlu0 %791, %v844_v39  }
  0xb4   :  { %373 = vperm.xlu1 %790, %v846_v43   ;;  %v852_v46 = vpop.eup %851 }
  0xb5   :  { %v854_v47 = vpop.eup %853 }
  0xb7   :  { %388 = vperm.xlu0 %791, %v848_v44  }
  0xb8   :  { %323 = vperm.xlu1 %790, %v850_v45   ;;  %v856_v49 = vpop.eup %855 }
  0xbb   :  { %398 = vperm.xlu0 %791, %v852_v46   ;;  %v858_v50 = vpop.eup %857 }
  0xbc   :  { %333 = vperm.xlu1 %790, %v854_v47  }
  0xc0   :  { %383 = vperm.xlu1 %790, %v856_v49  }
  0xc4   :  { %393 = vperm.xlu1 %790, %v858_v50  }
  0xc9   :  { %v763_v53 = vpop.f32.mrf.mxu0 }
  0xca   :  { %v113_v21 = vadd.f32 %v763_v53, %v671_v57 }
  0xcb   :  { %v104_v54 = vpop.f32.mrf.mxu0 }
  0xcc   :  { %v105_v61 = vadd.f32 %v671_v57, %v104_v54  ;;  %v678_v30 = vmul.f32 -1.442695, %v113_v21 }
  0xcd   :  { %v764_v56 = vpop.f32.mrf.mxu0 }
  0xce   :  { %v676_v63 = vmul.f32 -1.442695, %v105_v61  ;;  %v116_v0 = vadd.f32 %v764_v56, %v671_v57 }
  0xcf   :  { %v107_v60 = vpop.f32.mrf.mxu0 }
  0xd0   :  { %v108_v62 = vadd.f32 %v671_v57, %v107_v60  ;;  %859 = vpow2.f32 %v676_v63  ;;  %v679_v2 = vmul.f32 -1.442695, %v116_v0 }
  0xd2   :  { %v677_v1 = vmul.f32 -1.442695, %v108_v62 }
  0xd4   :  { %861 = vpow2.f32 %v677_v1 }
  0xd5   :  { %863 = vpow2.f32 %v678_v30 }
  0xd6   :  { %865 = vpow2.f32 %v679_v2 }
  0xdd   :  { %v860_v3 = vpop.eup %859 }
  0xde   :  { %v131_v5 = vadd.f32 1.0, %v860_v3 }
  0xe0   :  { %867 = vrcp.f32 %v131_v5 }
  0xe1   :  { %v862_v4 = vpop.eup %861 }
  0xe2   :  { %v864_v6 = vpop.eup %863  ;;  %v132_v7 = vadd.f32 1.0, %v862_v4 }
  0xe3   :  { %v866_v9 = vpop.eup %865  ;;  %v133_v10 = vadd.f32 1.0, %v864_v6 }
  0xe4   :  { %v134_v11 = vadd.f32 1.0, %v866_v9  ;;  %869 = vrcp.f32 %v132_v7 }
  0xe5   :  { %871 = vrcp.f32 %v133_v10 }
  0xe6   :  { %873 = vrcp.f32 %v134_v11 }
  0xed   :  { %v868_v27 = vpop.eup %867 }
  0xf1   :  { %v870_v34 = vpop.eup %869 }
  0xf2   :  { %v872_v37 = vpop.eup %871 }
  0xf3   :  { %v874_v44 = vpop.eup %873 }
 0x11e   :  { %v354_v25 = vpop.permute.xlu0 %353 }
 0x11f   :  { %v344_v26 = vpop.permute.xlu1 %343  ;;  %v407_v38 = vmul.f32 %v722_v16, %v354_v25 }
 0x120   :  { %v405_v31 = vmul.f32 %v718_v17, %v344_v26 }
 0x121   :  { %v423_v47 = vadd.f32 %v872_v37, %v407_v38 }
 0x122   :  { %v369_v32 = vpop.permute.xlu0 %368  ;;  %v421_v39 = vadd.f32 %v868_v27, %v405_v31 }
 0x123   :  { %v349_v35 = vpop.permute.xlu1 %348  ;;  %v410_v49 = vmul.f32 %v727_v19, %v369_v32 }
 0x124   :  { %v406_v36 = vmul.f32 %v719_v18, %v349_v35 }
 0x125   :  { %v426_v54 = vadd.f32 %v870_v34, %v410_v49 }
 0x126   :  { %v422_v42 = vadd.f32 %v870_v34, %v406_v36  ;;  %v379_v43 = vpop.permute.xlu0 %378 }
 0x127   :  { %v359_v45 = vpop.permute.xlu1 %358  ;;  %v412_v56 = vmul.f32 %v731_v22, %v379_v43 }
 0x128   :  { %v408_v46 = vmul.f32 %v723_v23, %v359_v45  ;;  %v435_v17 = vpack.c.bf16 %v422_v42, %v421_v39 }
 0x129   :  { %v428_v61 = vadd.f32 %v874_v44, %v412_v56 }
 0x12a   :  { %v424_v13 = vadd.f32 %v874_v44, %v408_v46  ;;  %771 = vmatprep.mubr.msk.bf16.mxu1 %vm455_vm4, %v435_v17  ;;  %v329_v18 = vpop.permute.xlu0 %328 }
 0x12b   :  { %v364_v50 = vpop.permute.xlu1 %363  ;;  %v402_v62 = vmul.f32 %v711_v24, %v329_v18 }
 0x12c   :  { %v436_v16 = vpack.c.bf16 %v424_v13, %v423_v47  ;;  %v409_v53 = vmul.f32 %v726_v33, %v364_v50 }
 0x12d   :  { %v418_v0 = vadd.f32 %v870_v34, %v402_v62 }
 0x12e   :  { %v425_v12 = vadd.f32 %v868_v27, %v409_v53  ;;  %772 = vmatmul.mubr.msk.bf16.vlgmr.msra.gmra.mxu1 %vm455_vm4, %v436_v16  ;;  %v339_v57 = vpop.permute.xlu0 %338 }
 0x12f   :  { %v374_v23 = vpop.permute.xlu1 %373  ;;  %v404_v1 = vmul.f32 %v715_v40, %v339_v57 }
 0x130   :  { %v437_v60 = vpack.c.bf16 %v426_v54, %v425_v12  ;;  %v411_v19 = vmul.f32 %v730_v48, %v374_v23 }
 0x131   :  { %v420_v2 = vadd.f32 %v874_v44, %v404_v1 }
 0x132   :  { %v427_v21 = vadd.f32 %v872_v37, %v411_v19  ;;  %775 = vmatprep.mubr.msk.bf16.mxu1 %vm455_vm4, %v437_v60  ;;  %v389_v63 = vpop.permute.xlu0 %388 }
 0x133   :  { %v324_v14 = vpop.permute.xlu1 %323  ;;  %v414_v3 = vmul.f32 %v735_v51, %v389_v63 }
 0x134   :  { %v438_v33 = vpack.c.bf16 %v428_v61, %v427_v21  ;;  %v401_v22 = vmul.f32 %v710_v55, %v324_v14 }
 0x135   :  { %v430_v6 = vadd.f32 %v870_v34, %v414_v3 }
 0x136   :  { %v417_v30 = vadd.f32 %v868_v27, %v401_v22  ;;  %776 = vmatmul.mubr.msk.bf16.gmra.mxu1 %vm455_vm4, %v438_v33  ;;  %v399_v20 = vpop.permute.xlu0 %398 }
 0x137   :  { %v334_v15 = vpop.permute.xlu1 %333  ;;  %v416_v7 = vmul.f32 %v739_v58, %v399_v20  ;;  %v1113_v58 = vld [vmem:[%s1171_s7] ss:$0 sm:$0xff] }
 0x138   :  { %v433_v48 = vpack.c.bf16 %v418_v0, %v417_v30  ;;  %v403_v24 = vmul.f32 %v714_v59, %v334_v15 }
 0x139   :  { %v432_v10 = vadd.f32 %v874_v44, %v416_v7 }
 0x13a   :  { %v419_v4 = vadd.f32 %v872_v37, %v403_v24  ;;  %767 = vmatprep.mubr.msk.bf16.mxu0 %vm455_vm4, %v433_v48 }
 0x13b   :  { %v384_v55 = vpop.permute.xlu1 %383 }
 0x13c   :  { %v434_v5 = vpack.c.bf16 %v420_v2, %v419_v4  ;;  %v413_v40 = vmul.f32 %v734_v8, %v384_v55 }
 0x13e   :  { %v429_v9 = vadd.f32 %v868_v27, %v413_v40  ;;  %768 = vmatmul.mubr.msk.bf16.vlgmr.msra.gmra.mxu0 %vm455_vm4, %v434_v5 }
 0x13f   :  { %v394_v29 = vpop.permute.xlu1 %393 }
 0x140   :  { %v439_v59 = vpack.c.bf16 %v430_v6, %v429_v9  ;;  %v415_v51 = vmul.f32 %v738_v28, %v394_v29 }
 0x142   :  { %v431_v11 = vadd.f32 %v872_v37, %v415_v51  ;;  %779 = vmatprep.mubr.msk.bf16.mxu1 %vm455_vm4, %v439_v59 }
 0x144   :  { %v440_v25 = vpack.c.bf16 %v432_v10, %v431_v11 }
 0x146   :  { %780 = vmatmul.mubr.msk.bf16.gmra.mxu1 %vm455_vm4, %v440_v25 }
 0x1ee   :  { %v773_v41 = vpop.f32.mrf.mxu1 }
 0x1ef   :  { %v543_v31 = vadd.f32 %v773_v41, %v1113_v58 }
 0x1f0   :  { %v534_v8 = vpop.f32.mrf.mxu1 }
 0x1f1   :  { %v535_v28 = vadd.f32 %v1113_v58, %v534_v8  ;;  %v603_v37 = vmul.f32 0.02, %v543_v31  ;;  %vm587_vm5 = vcmp.ge.f32.partialorder %v543_v31, 0.0 }
 0x1f2   :  { %v774_v26 = vpop.f32.mrf.mxu1 }
 0x1f3   :  { %v546_v32 = vadd.f32 %v774_v26, %v1113_v58  ;;  %vm585_vm6 = vcmp.ge.f32.partialorder %v535_v28, 0.0  ;;  %v601_v38 = vmul.f32 0.02, %v535_v28  ;;  %v619_v17 = vsel %vm587_vm5, %v543_v31, %v603_v37 }
 0x1f4   :  { %v537_v27 = vpop.f32.mrf.mxu1  ;;  %v645_v57 = vsel %vm629_vm10, %v619_v17, 0.0 }
 0x1f5   :  { %v538_v34 = vadd.f32 %v1113_v58, %v537_v27  ;;  %v604_v39 = vmul.f32 0.02, %v546_v32  ;;  %vm588_vm7 = vcmp.ge.f32.partialorder %v546_v32, 0.0  ;;  %v617_v47 = vsel %vm585_vm6, %v535_v28, %v601_v38 }
 0x1f6   :  { %v777_v52 = vpop.f32.mrf.mxu1  ;;  %v631_v60 = vsel %vm629_vm10, %v617_v47, 0.0 }
 0x1f7   :  { %v559_v35 = vadd.f32 %v777_v52, %v1113_v58  ;;  %v602_v43 = vmul.f32 0.02, %v538_v34  ;;  %vm586_vm8 = vcmp.ge.f32.partialorder %v538_v34, 0.0  ;;  %v620_v49 = vsel %vm588_vm7, %v546_v32, %v604_v39 }
 0x1f8   :  { %v550_v36 = vpop.f32.mrf.mxu1  ;;  %v652_v19 = vsel %vm629_vm10, %v620_v49, 0.0 }
 0x1f9   :  { %v607_v44 = vmul.f32 0.02, %v559_v35  ;;  %v551_v45 = vadd.f32 %v1113_v58, %v550_v36  ;;  %vm591_vm9 = vcmp.ge.f32.partialorder %v559_v35, 0.0  ;;  %v618_v50 = vsel %vm586_vm8, %v538_v34, %v602_v43 }
 0x1fa   :  { %v778_v42 = vpop.f32.mrf.mxu1  ;;  %v638_v22 = vsel %vm629_vm10, %v618_v50, 0.0 }
 0x1fb   :  { %v623_v16 = vsel %vm591_vm9, %v559_v35, %v607_v44  ;;  %vm589_vm11 = vcmp.ge.f32.partialorder %v551_v45, 0.0  ;;  %v605_v53 = vmul.f32 0.02, %v551_v45  ;;  %v562_v56 = vadd.f32 %v778_v42, %v1113_v58 }
 0x1fc   :  { %v553_v13 = vpop.f32.mrf.mxu1  ;;  %v647_v63 = vsel %vm629_vm10, %v623_v16, 0.0 }
 0x1fd   :  { %v554_v61 = vadd.f32 %v1113_v58, %v553_v13  ;;  %v621_v0 = vsel %vm589_vm11, %v551_v45, %v605_v53  ;;  %v608_v15 = vmul.f32 0.02, %v562_v56  ;;  %vm592_vm15 = vcmp.ge.f32.partialorder %v562_v56, 0.0 }
 0x1fe   :  { %v769_v46 = vpop.f32.mrf.mxu0  ;;  %v633_v6 = vsel %vm629_vm10, %v621_v0, 0.0 }
 0x1ff   :  { %v527_v18 = vadd.f32 %v769_v46, %v1113_v58  ;;  %v606_v2 = vmul.f32 0.02, %v554_v61  ;;  %vm590_vm0 = vcmp.ge.f32.partialorder %v554_v61, 0.0  ;;  %v624_v11 = vsel %vm592_vm15, %v562_v56, %v608_v15 }
 0x200   :  { %v518_v54 = vpop.f32.mrf.mxu0  ;;  %v654_v43 = vsel %vm629_vm10, %v624_v11, 0.0 }
 0x201   :  { %vm583_vm12 = vcmp.ge.f32.partialorder %v527_v18, 0.0  ;;  %v599_v12 = vmul.f32 0.02, %v527_v18  ;;  %v519_v23 = vadd.f32 %v1113_v58, %v518_v54  ;;  %v622_v25 = vsel %vm590_vm0, %v554_v61, %v606_v2 }
 0x202   :  { %v770_v62 = vpop.f32.mrf.mxu0  ;;  %v640_v49 = vsel %vm629_vm10, %v622_v25, 0.0 }
 0x203   :  { %v615_v21 = vsel %vm583_vm12, %v527_v18, %v599_v12  ;;  %vm581_vm13 = vcmp.ge.f32.partialorder %v519_v23, 0.0  ;;  %v597_v14 = vmul.f32 0.02, %v519_v23  ;;  %v530_v33 = vadd.f32 %v770_v62, %v1113_v58 }
 0x204   :  { %v644_v1 = vsel %vm629_vm10, %v615_v21, 0.0  ;;  %v521_v30 = vpop.f32.mrf.mxu0 }
 0x205   :  { %v613_v48 = vsel %vm581_vm13, %v519_v23, %v597_v14  ;;  %vm584_vm14 = vcmp.ge.f32.partialorder %v530_v33, 0.0  ;;  %v600_v24 = vmul.f32 0.02, %v530_v33  ;;  %v646_v3 = vadd.f32 %v645_v57, %v644_v1 }
 0x206   :  { %v630_v4 = vsel %vm629_vm10, %v613_v48, 0.0  ;;  %v522_v20 = vadd.f32 %v1113_v58, %v521_v30  ;;  %v781_v55 = vpop.f32.mrf.mxu1 }
 0x207   :  { %v616_v5 = vsel %vm584_vm14, %v530_v33, %v600_v24  ;;  %v575_v40 = vadd.f32 %v781_v55, %v1113_v58  ;;  %v632_v7 = vadd.f32 %v631_v60, %v630_v4  ;;  %v648_v8 = vadd.f32 %v647_v63, %v646_v3 }
 0x208   :  { %vm582_vm1 = vcmp.ge.f32.partialorder %v522_v20, 0.0  ;;  %v598_v9 = vmul.f32 0.02, %v522_v20  ;;  %v566_v29 = vpop.f32.mrf.mxu1  ;;  %v651_v59 = vsel %vm629_vm10, %v616_v5, 0.0 }
 0x209   :  { %vm595_vm2 = vcmp.ge.f32.partialorder %v575_v40, 0.0  ;;  %v611_v51 = vmul.f32 0.02, %v575_v40  ;;  %v567_v10 = vadd.f32 %v1113_v58, %v566_v29  ;;  %v653_v28 = vadd.f32 %v652_v19, %v651_v59 }
 0x20a   :  { %v614_v41 = vsel %vm582_vm1, %v522_v20, %v598_v9  ;;  %v782_v26 = vpop.f32.mrf.mxu1  ;;  %v634_v34 = vadd.f32 %v633_v6, %v632_v7 }
 0x20b   :  { %v637_v27 = vsel %vm629_vm10, %v614_v41, 0.0  ;;  %v627_v31 = vsel %vm595_vm2, %v575_v40, %v611_v51  ;;  %vm593_vm3 = vcmp.ge.f32.partialorder %v567_v10, 0.0  ;;  %v609_v52 = vmul.f32 0.02, %v567_v10 }
 0x20c   :  { %v649_v32 = vsel %vm629_vm10, %v627_v31, 0.0  ;;  %v578_v35 = vadd.f32 %v782_v26, %v1113_v58  ;;  %v569_v36 = vpop.f32.mrf.mxu1  ;;  %v639_v37 = vadd.f32 %v638_v22, %v637_v27  ;;  %v655_v18 = vadd.f32 %v654_v43, %v653_v28 }
 0x20d   :  { %v650_v38 = vadd.f32 %v649_v32, %v648_v8  ;;  %v625_v39 = vsel %vm593_vm3, %v567_v10, %v609_v52  ;;  %v570_v42 = vadd.f32 %v1113_v58, %v569_v36 }
 0x20e   :  { %v635_v44 = vsel %vm629_vm10, %v625_v39, 0.0  ;;  %vm596_vm4 = vcmp.ge.f32.partialorder %v578_v35, 0.0  ;;  %v612_v45 = vmul.f32 0.02, %v578_v35  ;;  %v641_v53 = vadd.f32 %v640_v49, %v639_v37 }
 0x20f   :  { %v661_v46 = vmul.f32 0.25, %v650_v38  ;;  %v636_v17 = vadd.f32 %v635_v44, %v634_v34  ;;  %vm594_vm5 = vcmp.ge.f32.partialorder %v570_v42, 0.0  ;;  %v610_v47 = vmul.f32 0.02, %v570_v42 }
 0x210   :  { %v628_v13 = vsel %vm596_vm4, %v578_v35, %v612_v45 }
 0x211   :  { %665 = vst.msk [vmem:[%s1172_s8 + $0x10] sm:$0xff] %vm629_vm10, %v661_v46  ;;  %v659_v58 = vmul.f32 0.25, %v636_v17  ;;  %v656_v50 = vsel %vm629_vm10, %v628_v13, 0.0  ;;  %v626_v16 = vsel %vm594_vm5, %v570_v42, %v610_v47 }
 0x212   :  { %v657_v54 = vadd.f32 %v656_v50, %v655_v18  ;;  %v642_v56 = vsel %vm629_vm10, %v626_v16, 0.0 }
 0x213   :  { %663 = vst.msk [vmem:[%s1172_s8] sm:$0xff] %vm629_vm10, %v659_v58  ;;  %v643_v12 = vadd.f32 %v642_v56, %v641_v53 }
 0x214   :  { %v662_v23 = vmul.f32 0.25, %v657_v54 }
 0x215   :  { %v660_v57 = vmul.f32 0.25, %v643_v12 }
 0x216   :  { %666 = vst.msk [vmem:[%s1172_s8 + $0x18] sm:$0xff] %vm629_vm10, %v662_v23 }
 0x217   :  { %664 = vst.msk [vmem:[%s1172_s8 + $0x8] sm:$0xff] %vm629_vm10, %v660_v57 }

// kernel: _lambda_.4
= control target key start
LH: loop header
LB: loop body
LE: loop exit
PB: predicated region body
PF: predicated region fallthrough
CT: control target
= control target key end

     0   :  { %vm63_vm0 = vcmask 1043456   ;;  %vm56_vm1 = vcmask 64512   ;;  %v874_v3 = vmov 12   ;;  %vm477_vm2 = vcmask 1045504   ;;  %s1161_s4 = inlined_call_operand.<no memory space> [shape: f32[1,1], index: 4, kind: input, shape index: {}]   ;;  %s1162_s5 = inlined_call_operand.<no memory space> [shape: f32[1,1], index: 5, kind: input, shape index: {}]   ;;  %s1163_s2 = inlined_call_operand.vmem [shape: bf16[8,13], index: 2, kind: input, shape index: {}]   ;;  %s1164_s0 = inlined_call_operand.vmem [shape: bf16[32,8], index: 0, kind: input, shape index: {}]   ;;  %s1165_s1 = inlined_call_operand.vmem [shape: bf16[4,32,13], index: 1, kind: input, shape index: {}]   ;;  %s1166_s6 = inlined_call_operand.vmem [shape: bf16[13,16], index: 6, kind: input, shape index: {}]   ;;  %s1167_s3 = inlined_call_operand.vmem [shape: f32[1,13], index: 3, kind: input, shape index: {}]   ;;  %s1168_s7 = inlined_call_operand.vmem [shape: f32[1,16], index: 7, kind: input, shape index: {}]   ;;  %s1169_s8 = inlined_call_operand.vmem [shape: f32[32,16], index: 8, kind: output, shape index: {}]  }
   0x1   :  { %v13_v0 = vstv %s1161_s4  ;;  %v15_v1 = vstv %s1162_s5  ;;  %v38_v2 = vld [vmem:[%s1163_s2] sm:$0xf]  ;;  %790 = vset.pattern.permute.xlu0 %v874_v3  ;;  %789 = vset.pattern.permute.xlu1 %v874_v3  ;;  %v792_v6 = vld [vmem:[%s1164_s0 + $0x8] sm:$0xff]   ;;  %s875_s2 = smov 12   ;;  %vm478_vm3 = vcmask 1046528   ;;  %vm452_vm4 = vcmask 105472  }
   0x2   :  { %14 = vst [vmem:[#allocation2] sm:$0x1] %v13_v0  ;;  %16 = vst [vmem:[#allocation3] sm:$0x1] %v15_v1  ;;  %785 = vmatprep.subr.msk.bf16.mxu0 %vm63_vm0, %v38_v2  ;;  %v65_v4 = vsel %vm63_vm0, %v38_v2, 0  ;;  %v791_v5 = vld [vmem:[%s1164_s0] sm:$0xff]  }
   0x3   :  { %760 = vmatpush3.bf16.msra.mxu0 %v65_v4  ;;  %761 = vmatprep.mubr.msk.bf16.mxu0 %vm56_vm1, %v791_v5  ;;  %v940_v9 = vld [vmem:[%s1165_s1 + $0x18] sm:$0xff]   ;;  %v945_v10 = vld [vmem:[%s1165_s1 + $0x10] sm:$0xff]   ;;  %v950_v11 = vld [vmem:[%s1165_s1 + $0x20] sm:$0xff]   ;;  %vm629_vm10 = vcmask 130048  }
   0x4   :  { %v955_v12 = vld [vmem:[%s1165_s1 + $0x28] sm:$0xff]   ;;  %v722_v13 = vunpack.c.l.bf16 %v940_v9  ;;  %v718_v14 = vunpack.c.l.bf16 %v945_v10  ;;  %v719_v15 = vunpack.c.h.bf16 %v945_v10  ;;  %v727_v16 = vunpack.c.h.bf16 %v950_v11  ;;  %v964_v17 = vld [vmem:[%s1165_s1] sm:$0xff]   ;;  %v1007_v38 = vld [vmem:[%s1165_s1 + $0x30] sm:$0xff]  }
   0x5   :  { %v731_v19 = vunpack.c.h.bf16 %v955_v12  ;;  %v723_v20 = vunpack.c.h.bf16 %v940_v9  ;;  %v711_v21 = vunpack.c.h.bf16 %v964_v17  ;;  %v986_v26 = vld [vmem:[%s1165_s1 + $0x8] sm:$0xff]   ;;  %v726_v30 = vunpack.c.l.bf16 %v950_v11  ;;  %v1021_v49 = vld [vmem:[%s1165_s1 + $0x38] sm:$0xff]  }
   0x6   :  { %762 = vmatmul.mubr.msk.bf16.vlgmr.msra.gmra.mxu0 %vm56_vm1, %v792_v6  ;;  %v715_v37 = vunpack.c.h.bf16 %v986_v26  ;;  %v730_v45 = vunpack.c.l.bf16 %v955_v12  ;;  %v735_v48 = vunpack.c.h.bf16 %v1007_v38  ;;  %v710_v52 = vunpack.c.l.bf16 %v964_v17 }
   0x7   :  { %v739_v55 = vunpack.c.h.bf16 %v1021_v49  ;;  %v714_v56 = vunpack.c.l.bf16 %v986_v26  ;;  %v734_v5 = vunpack.c.l.bf16 %v1007_v38 }
   0x9   :  { %v680_v7 = vld [vmem:[#allocation2] ss:$0 sm:$0xff]  ;;  %v681_v8 = vld [vmem:[#allocation3] ss:$0 sm:$0xff] }
   0xa   :  { %178 = vrot.lane.b32.xlu0 %v680_v7, %s875_s2 }
   0xe   :  { %203 = vrot.lane.b32.xlu0 %v681_v8, %s875_s2 }
  0x7c   :  { %v966_v18 = vpop.permute.xlu0 %178 }
  0x7d   :  { %v187_v22 = vmul.f32 %v722_v13, %v966_v18  ;;  %v185_v23 = vmul.f32 %v718_v14, %v966_v18  ;;  %v186_v24 = vmul.f32 %v719_v15, %v966_v18  ;;  %v190_v25 = vmul.f32 %v727_v16, %v966_v18 }
  0x7e   :  { %v192_v28 = vmul.f32 %v731_v19, %v966_v18  ;;  %v188_v29 = vmul.f32 %v723_v20, %v966_v18  ;;  %v182_v42 = vmul.f32 %v711_v21, %v966_v18  ;;  %v189_v44 = vmul.f32 %v726_v30, %v966_v18 }
  0x7f   :  { %v184_v53 = vmul.f32 %v715_v37, %v966_v18  ;;  %v191_v54 = vmul.f32 %v730_v45, %v966_v18  ;;  %v194_v59 = vmul.f32 %v735_v48, %v966_v18  ;;  %v181_v62 = vmul.f32 %v710_v52, %v966_v18 }
  0x80   :  { %v988_v27 = vpop.permute.xlu0 %203  ;;  %v196_v2 = vmul.f32 %v739_v55, %v966_v18  ;;  %v183_v4 = vmul.f32 %v714_v56, %v966_v18 }
  0x81   :  { %v212_v31 = vadd.f32 %v988_v27, %v187_v22  ;;  %v210_v32 = vadd.f32 %v988_v27, %v185_v23  ;;  %v211_v33 = vadd.f32 %v988_v27, %v186_v24  ;;  %v215_v34 = vadd.f32 %v988_v27, %v190_v25 }
  0x82   :  { %v217_v35 = vadd.f32 %v988_v27, %v192_v28  ;;  %v213_v36 = vadd.f32 %v988_v27, %v188_v29  ;;  %v207_v47 = vadd.f32 %v988_v27, %v182_v42  ;;  %v214_v51 = vadd.f32 %v988_v27, %v189_v44 }
  0x83   :  { %v688_v39 = vmul.f32 -1.442695, %v212_v31  ;;  %v686_v40 = vmul.f32 -1.442695, %v210_v32  ;;  %v687_v41 = vmul.f32 -1.442695, %v211_v33  ;;  %v209_v58 = vadd.f32 %v988_v27, %v184_v53 }
  0x84   :  { %v691_v43 = vmul.f32 -1.442695, %v215_v34  ;;  %v693_v46 = vmul.f32 -1.442695, %v217_v35  ;;  %v689_v50 = vmul.f32 -1.442695, %v213_v36  ;;  %v216_v61 = vadd.f32 %v988_v27, %v191_v54 }
  0x85   :  { %794 = vpow2.f32 %v688_v39  ;;  %v683_v57 = vmul.f32 -1.442695, %v207_v47  ;;  %v690_v60 = vmul.f32 -1.442695, %v214_v51  ;;  %v219_v63 = vadd.f32 %v988_v27, %v194_v59 }
  0x86   :  { %796 = vpow2.f32 %v686_v40  ;;  %v206_v0 = vadd.f32 %v988_v27, %v181_v62  ;;  %v685_v1 = vmul.f32 -1.442695, %v209_v58  ;;  %v692_v3 = vmul.f32 -1.442695, %v216_v61 }
  0x87   :  { %798 = vpow2.f32 %v687_v41  ;;  %v695_v6 = vmul.f32 -1.442695, %v219_v63  ;;  %v221_v7 = vadd.f32 %v988_v27, %v196_v2  ;;  %v208_v22 = vadd.f32 %v988_v27, %v183_v4 }
  0x88   :  { %800 = vpow2.f32 %v691_v43  ;;  %v682_v8 = vmul.f32 -1.442695, %v206_v0  ;;  %v193_v24 = vmul.f32 %v734_v5, %v966_v18  ;;  %v738_v25 = vunpack.c.l.bf16 %v1021_v49 }
  0x89   :  { %802 = vpow2.f32 %v693_v46  ;;  %v697_v31 = vmul.f32 -1.442695, %v221_v7  ;;  %v684_v34 = vmul.f32 -1.442695, %v208_v22 }
  0x8a   :  { %804 = vpow2.f32 %v689_v50  ;;  %v218_v35 = vadd.f32 %v988_v27, %v193_v24  ;;  %v195_v42 = vmul.f32 %v738_v25, %v966_v18 }
  0x8b   :  { %806 = vpow2.f32 %v683_v57 }
  0x8c   :  { %808 = vpow2.f32 %v690_v60  ;;  %v694_v44 = vmul.f32 -1.442695, %v218_v35  ;;  %v220_v46 = vadd.f32 %v988_v27, %v195_v42 }
  0x8d   :  { %810 = vpow2.f32 %v685_v1 }
  0x8e   :  { %812 = vpow2.f32 %v692_v3  ;;  %v696_v54 = vmul.f32 -1.442695, %v220_v46 }
  0x8f   :  { %814 = vpow2.f32 %v695_v6 }
  0x90   :  { %816 = vpow2.f32 %v682_v8 }
  0x92   :  { %v795_v23 = vpop.eup %794 }
  0x93   :  { %v797_v28 = vpop.eup %796  ;;  %v276_v29 = vadd.f32 1.0, %v795_v23 }
  0x94   :  { %v799_v32 = vpop.eup %798  ;;  %v274_v33 = vadd.f32 1.0, %v797_v28 }
  0x95   :  { %v801_v36 = vpop.eup %800  ;;  %818 = vrcp.f32 %v276_v29  ;;  %v275_v41 = vadd.f32 1.0, %v799_v32 }
  0x96   :  { %v803_v39 = vpop.eup %802  ;;  %820 = vrcp.f32 %v274_v33  ;;  %v279_v40 = vadd.f32 1.0, %v801_v36 }
  0x97   :  { %v805_v43 = vpop.eup %804  ;;  %822 = vpow2.f32 %v697_v31  ;;  %v281_v47 = vadd.f32 1.0, %v803_v39  ;;  %v793_v31 = vld [vmem:[%s1166_s6] sm:$0x7f]  }
  0x98   :  { %824 = vpow2.f32 %v684_v34  ;;  %v807_v50 = vpop.eup %806  ;;  %v277_v51 = vadd.f32 1.0, %v805_v43  ;;  %v876_v34 = vmov 65535  }
  0x99   :  { %826 = vrcp.f32 %v279_v40  ;;  %v809_v53 = vpop.eup %808  ;;  %v271_v57 = vadd.f32 1.0, %v807_v50  ;;  %v479_v35 = vsel %vm477_vm2, 4294967295, %v876_v34 }
  0x9a   :  { %828 = vrcp.f32 %v275_v41  ;;  %v811_v58 = vpop.eup %810  ;;  %v278_v59 = vadd.f32 1.0, %v809_v53  ;;  %v480_v39 = vsel %vm478_vm3, %v479_v35, 0 }
  0x9b   :  { %830 = vpow2.f32 %v694_v44  ;;  %v813_v18 = vpop.eup %812  ;;  %v273_v62 = vadd.f32 1.0, %v811_v58  ;;  %v482_v40 = vand.u32 %v793_v31, %v480_v39 }
  0x9c   :  { %832 = vrcp.f32 %v281_v47  ;;  %v815_v60 = vpop.eup %814  ;;  %v280_v63 = vadd.f32 1.0, %v813_v18 }
  0x9d   :  { %834 = vrcp.f32 %v277_v51  ;;  %v817_v61 = vpop.eup %816  ;;  %v283_v3 = vadd.f32 1.0, %v815_v60  ;;  %783 = vmatprep.subr.bf16.mxu1 %v482_v40  ;;  %765 = vmatprep.subr.bf16.mxu0 %v482_v40 }
  0x9e   :  { %836 = vpow2.f32 %v696_v54  ;;  %v270_v6 = vadd.f32 1.0, %v817_v61  ;;  %784 = vmatpush3.bf16.msra.mxu1 %v482_v40  ;;  %766 = vmatpush3.bf16.msra.mxu0 %v482_v40 }
  0x9f   :  { %838 = vrcp.f32 %v271_v57 }
  0xa0   :  { %840 = vrcp.f32 %v278_v59  ;;  %v671_v59 = vld [vmem:[%s1167_s3] ss:$0 sm:$0xff] }
  0xa1   :  { %842 = vrcp.f32 %v273_v62 }
  0xa2   :  { %v819_v27 = vpop.eup %818  ;;  %844 = vrcp.f32 %v280_v63 }
  0xa3   :  { %v821_v0 = vpop.eup %820  ;;  %350 = vperm.xlu0 %790, %v819_v27   ;;  %846 = vrcp.f32 %v283_v3 }
  0xa4   :  { %v823_v1 = vpop.eup %822  ;;  %340 = vperm.xlu1 %789, %v821_v0   ;;  %848 = vrcp.f32 %v270_v6 }
  0xa5   :  { %v825_v2 = vpop.eup %824  ;;  %v285_v22 = vadd.f32 1.0, %v823_v1 }
  0xa6   :  { %v827_v4 = vpop.eup %826  ;;  %v272_v24 = vadd.f32 1.0, %v825_v2 }
  0xa7   :  { %v829_v7 = vpop.eup %828  ;;  %365 = vperm.xlu0 %790, %v827_v4   ;;  %850 = vrcp.f32 %v285_v22 }
  0xa8   :  { %345 = vperm.xlu1 %789, %v829_v7   ;;  %v831_v8 = vpop.eup %830  ;;  %852 = vrcp.f32 %v272_v24 }
  0xa9   :  { %v833_v23 = vpop.eup %832  ;;  %v282_v33 = vadd.f32 1.0, %v831_v8 }
  0xaa   :  { %v835_v28 = vpop.eup %834 }
  0xab   :  { %375 = vperm.xlu0 %790, %v833_v23   ;;  %v837_v29 = vpop.eup %836  ;;  %854 = vrcp.f32 %v282_v33 }
  0xac   :  { %355 = vperm.xlu1 %789, %v835_v28   ;;  %v839_v32 = vpop.eup %838  ;;  %v284_v42 = vadd.f32 1.0, %v837_v29 }
  0xad   :  { %v841_v36 = vpop.eup %840 }
  0xae   :  { %v843_v41 = vpop.eup %842  ;;  %856 = vrcp.f32 %v284_v42 }
  0xaf   :  { %325 = vperm.xlu0 %790, %v839_v32   ;;  %v845_v43 = vpop.eup %844 }
  0xb0   :  { %360 = vperm.xlu1 %789, %v841_v36   ;;  %v847_v44 = vpop.eup %846 }
  0xb1   :  { %v849_v46 = vpop.eup %848 }
  0xb3   :  { %335 = vperm.xlu0 %790, %v843_v41  }
  0xb4   :  { %370 = vperm.xlu1 %789, %v845_v43   ;;  %v851_v47 = vpop.eup %850 }
  0xb5   :  { %v853_v50 = vpop.eup %852 }
  0xb7   :  { %385 = vperm.xlu0 %790, %v847_v44  }
  0xb8   :  { %320 = vperm.xlu1 %789, %v849_v46   ;;  %v855_v51 = vpop.eup %854 }
  0xbb   :  { %395 = vperm.xlu0 %790, %v851_v47   ;;  %v857_v53 = vpop.eup %856 }
  0xbc   :  { %330 = vperm.xlu1 %789, %v853_v50  }
  0xc0   :  { %380 = vperm.xlu1 %789, %v855_v51  }
  0xc4   :  { %390 = vperm.xlu1 %789, %v857_v53  }
  0xc6   :  { %v763_v54 = vpop.f32.mrf.mxu0 }
  0xc7   :  { %v110_v62 = vadd.f32 %v763_v54, %v671_v59 }
  0xc8   :  { %v101_v57 = vpop.f32.mrf.mxu0 }
  0xc9   :  { %v102_v60 = vadd.f32 %v671_v59, %v101_v57  ;;  %v678_v1 = vmul.f32 -1.442695, %v110_v62 }
  0xca   :  { %v764_v58 = vpop.f32.mrf.mxu0 }
  0xcb   :  { %v676_v27 = vmul.f32 -1.442695, %v102_v60  ;;  %v113_v63 = vadd.f32 %v764_v58, %v671_v59 }
  0xcc   :  { %v104_v18 = vpop.f32.mrf.mxu0 }
  0xcd   :  { %v105_v61 = vadd.f32 %v671_v59, %v104_v18  ;;  %858 = vpow2.f32 %v676_v27  ;;  %v679_v2 = vmul.f32 -1.442695, %v113_v63 }
  0xcf   :  { %v677_v0 = vmul.f32 -1.442695, %v105_v61 }
  0xd1   :  { %860 = vpow2.f32 %v677_v0 }
  0xd2   :  { %862 = vpow2.f32 %v678_v1 }
  0xd3   :  { %864 = vpow2.f32 %v679_v2 }
  0xda   :  { %v859_v3 = vpop.eup %858 }
  0xdb   :  { %v128_v6 = vadd.f32 1.0, %v859_v3 }
  0xdd   :  { %866 = vrcp.f32 %v128_v6 }
  0xde   :  { %v861_v4 = vpop.eup %860 }
  0xdf   :  { %v863_v7 = vpop.eup %862  ;;  %v129_v8 = vadd.f32 1.0, %v861_v4 }
  0xe0   :  { %v865_v22 = vpop.eup %864  ;;  %v130_v23 = vadd.f32 1.0, %v863_v7 }
  0xe1   :  { %v131_v24 = vadd.f32 1.0, %v865_v22  ;;  %868 = vrcp.f32 %v129_v8 }
  0xe2   :  { %870 = vrcp.f32 %v130_v23 }
  0xe3   :  { %872 = vrcp.f32 %v131_v24 }
  0xea   :  { %v867_v31 = vpop.eup %866 }
  0xee   :  { %v869_v34 = vpop.eup %868 }
  0xef   :  { %v871_v39 = vpop.eup %870 }
  0xf0   :  { %v873_v44 = vpop.eup %872 }
 0x11e   :  { %v351_v28 = vpop.permute.xlu0 %350 }
 0x11f   :  { %v341_v29 = vpop.permute.xlu1 %340  ;;  %v404_v40 = vmul.f32 %v722_v13, %v351_v28 }
 0x120   :  { %v402_v32 = vmul.f32 %v718_v14, %v341_v29 }
 0x121   :  { %v420_v50 = vadd.f32 %v871_v39, %v404_v40 }
 0x122   :  { %v366_v33 = vpop.permute.xlu0 %365  ;;  %v418_v41 = vadd.f32 %v867_v31, %v402_v32 }
 0x123   :  { %v346_v35 = vpop.permute.xlu1 %345  ;;  %v407_v51 = vmul.f32 %v727_v16, %v366_v33 }
 0x124   :  { %v403_v36 = vmul.f32 %v719_v15, %v346_v35 }
 0x125   :  { %v423_v57 = vadd.f32 %v869_v34, %v407_v51 }
 0x126   :  { %v419_v42 = vadd.f32 %v869_v34, %v403_v36  ;;  %v376_v43 = vpop.permute.xlu0 %375 }
 0x127   :  { %v356_v46 = vpop.permute.xlu1 %355  ;;  %v409_v58 = vmul.f32 %v731_v19, %v376_v43 }
 0x128   :  { %v405_v47 = vmul.f32 %v723_v20, %v356_v46  ;;  %v432_v14 = vpack.c.bf16 %v419_v42, %v418_v41 }
 0x129   :  { %v425_v60 = vadd.f32 %v873_v44, %v409_v58 }
 0x12a   :  { %v421_v10 = vadd.f32 %v873_v44, %v405_v47  ;;  %771 = vmatprep.mubr.msk.bf16.mxu1 %vm452_vm4, %v432_v14  ;;  %v326_v15 = vpop.permute.xlu0 %325 }
 0x12b   :  { %v361_v53 = vpop.permute.xlu1 %360  ;;  %v399_v61 = vmul.f32 %v711_v21, %v326_v15 }
 0x12c   :  { %v433_v13 = vpack.c.bf16 %v421_v10, %v420_v50  ;;  %v406_v54 = vmul.f32 %v726_v30, %v361_v53 }
 0x12d   :  { %v415_v63 = vadd.f32 %v869_v34, %v399_v61 }
 0x12e   :  { %v422_v9 = vadd.f32 %v867_v31, %v406_v54  ;;  %772 = vmatmul.mubr.msk.bf16.vlgmr.msra.gmra.mxu1 %vm452_vm4, %v433_v13  ;;  %v336_v59 = vpop.permute.xlu0 %335 }
 0x12f   :  { %v371_v20 = vpop.permute.xlu1 %370  ;;  %v401_v0 = vmul.f32 %v715_v37, %v336_v59 }
 0x130   :  { %v434_v18 = vpack.c.bf16 %v423_v57, %v422_v9  ;;  %v408_v16 = vmul.f32 %v730_v45, %v371_v20 }
 0x131   :  { %v417_v2 = vadd.f32 %v873_v44, %v401_v0 }
 0x132   :  { %v424_v62 = vadd.f32 %v871_v39, %v408_v16  ;;  %775 = vmatprep.mubr.msk.bf16.mxu1 %vm452_vm4, %v434_v18  ;;  %v386_v27 = vpop.permute.xlu0 %385 }
 0x133   :  { %v321_v11 = vpop.permute.xlu1 %320  ;;  %v411_v3 = vmul.f32 %v735_v48, %v386_v27 }
 0x134   :  { %v435_v30 = vpack.c.bf16 %v425_v60, %v424_v62  ;;  %v398_v19 = vmul.f32 %v710_v52, %v321_v11 }
 0x135   :  { %v427_v7 = vadd.f32 %v869_v34, %v411_v3 }
 0x136   :  { %v414_v1 = vadd.f32 %v867_v31, %v398_v19  ;;  %776 = vmatmul.mubr.msk.bf16.gmra.mxu1 %vm452_vm4, %v435_v30  ;;  %v396_v17 = vpop.permute.xlu0 %395 }
 0x137   :  { %v331_v12 = vpop.permute.xlu1 %330  ;;  %v413_v8 = vmul.f32 %v739_v55, %v396_v17  ;;  %v1110_v55 = vld [vmem:[%s1168_s7] ss:$0 sm:$0xff] }
 0x138   :  { %v430_v45 = vpack.c.bf16 %v415_v63, %v414_v1  ;;  %v400_v21 = vmul.f32 %v714_v56, %v331_v12 }
 0x139   :  { %v429_v23 = vadd.f32 %v873_v44, %v413_v8 }
 0x13a   :  { %v416_v4 = vadd.f32 %v871_v39, %v400_v21  ;;  %767 = vmatprep.mubr.msk.bf16.mxu0 %vm452_vm4, %v430_v45 }
 0x13b   :  { %v381_v52 = vpop.permute.xlu1 %380 }
 0x13c   :  { %v431_v6 = vpack.c.bf16 %v417_v2, %v416_v4  ;;  %v410_v37 = vmul.f32 %v734_v5, %v381_v52 }
 0x13e   :  { %v426_v22 = vadd.f32 %v867_v31, %v410_v37  ;;  %768 = vmatmul.mubr.msk.bf16.vlgmr.msra.gmra.mxu0 %vm452_vm4, %v431_v6 }
 0x13f   :  { %v391_v26 = vpop.permute.xlu1 %390 }
 0x140   :  { %v436_v56 = vpack.c.bf16 %v427_v7, %v426_v22  ;;  %v412_v48 = vmul.f32 %v738_v25, %v391_v26 }
 0x142   :  { %v428_v24 = vadd.f32 %v871_v39, %v412_v48  ;;  %779 = vmatprep.mubr.msk.bf16.mxu1 %vm452_vm4, %v436_v56 }
 0x144   :  { %v437_v28 = vpack.c.bf16 %v429_v23, %v428_v24 }
 0x146   :  { %780 = vmatmul.mubr.msk.bf16.gmra.mxu1 %vm452_vm4, %v437_v28 }
 0x1ee   :  { %v773_v38 = vpop.f32.mrf.mxu1 }
 0x1ef   :  { %v543_v32 = vadd.f32 %v773_v38, %v1110_v55 }
 0x1f0   :  { %v534_v5 = vpop.f32.mrf.mxu1 }
 0x1f1   :  { %v535_v25 = vadd.f32 %v1110_v55, %v534_v5  ;;  %v603_v39 = vmul.f32 0.02, %v543_v32  ;;  %vm587_vm5 = vcmp.ge.f32.partialorder %v543_v32, 0.0 }
 0x1f2   :  { %v774_v29 = vpop.f32.mrf.mxu1 }
 0x1f3   :  { %v546_v33 = vadd.f32 %v774_v29, %v1110_v55  ;;  %vm585_vm6 = vcmp.ge.f32.partialorder %v535_v25, 0.0  ;;  %v601_v40 = vmul.f32 0.02, %v535_v25  ;;  %v619_v14 = vsel %vm587_vm5, %v543_v32, %v603_v39 }
 0x1f4   :  { %v537_v31 = vpop.f32.mrf.mxu1  ;;  %v645_v59 = vsel %vm629_vm10, %v619_v14, 0.0 }
 0x1f5   :  { %v538_v34 = vadd.f32 %v1110_v55, %v537_v31  ;;  %v604_v41 = vmul.f32 0.02, %v546_v33  ;;  %vm588_vm7 = vcmp.ge.f32.partialorder %v546_v33, 0.0  ;;  %v617_v50 = vsel %vm585_vm6, %v535_v25, %v601_v40 }
 0x1f6   :  { %v777_v49 = vpop.f32.mrf.mxu1  ;;  %v631_v18 = vsel %vm629_vm10, %v617_v50, 0.0 }
 0x1f7   :  { %v559_v35 = vadd.f32 %v777_v49, %v1110_v55  ;;  %v602_v43 = vmul.f32 0.02, %v538_v34  ;;  %vm586_vm8 = vcmp.ge.f32.partialorder %v538_v34, 0.0  ;;  %v620_v51 = vsel %vm588_vm7, %v546_v33, %v604_v41 }
 0x1f8   :  { %v550_v36 = vpop.f32.mrf.mxu1  ;;  %v652_v16 = vsel %vm629_vm10, %v620_v51, 0.0 }
 0x1f9   :  { %v607_v44 = vmul.f32 0.02, %v559_v35  ;;  %v551_v46 = vadd.f32 %v1110_v55, %v550_v36  ;;  %vm591_vm9 = vcmp.ge.f32.partialorder %v559_v35, 0.0  ;;  %v618_v53 = vsel %vm586_vm8, %v538_v34, %v602_v43 }
 0x1fa   :  { %v778_v42 = vpop.f32.mrf.mxu1  ;;  %v638_v19 = vsel %vm629_vm10, %v618_v53, 0.0 }
 0x1fb   :  { %v623_v13 = vsel %vm591_vm9, %v559_v35, %v607_v44  ;;  %vm589_vm11 = vcmp.ge.f32.partialorder %v551_v46, 0.0  ;;  %v605_v54 = vmul.f32 0.02, %v551_v46  ;;  %v562_v58 = vadd.f32 %v778_v42, %v1110_v55 }
 0x1fc   :  { %v553_v10 = vpop.f32.mrf.mxu1  ;;  %v647_v27 = vsel %vm629_vm10, %v623_v13, 0.0 }
 0x1fd   :  { %v554_v60 = vadd.f32 %v1110_v55, %v553_v10  ;;  %v621_v63 = vsel %vm589_vm11, %v551_v46, %v605_v54  ;;  %v608_v12 = vmul.f32 0.02, %v562_v58  ;;  %vm592_vm15 = vcmp.ge.f32.partialorder %v562_v58, 0.0 }
 0x1fe   :  { %v769_v47 = vpop.f32.mrf.mxu0  ;;  %v633_v7 = vsel %vm629_vm10, %v621_v63, 0.0 }
 0x1ff   :  { %v527_v15 = vadd.f32 %v769_v47, %v1110_v55  ;;  %v606_v2 = vmul.f32 0.02, %v554_v60  ;;  %vm590_vm0 = vcmp.ge.f32.partialorder %v554_v60, 0.0  ;;  %v624_v24 = vsel %vm592_vm15, %v562_v58, %v608_v12 }
 0x200   :  { %v518_v57 = vpop.f32.mrf.mxu0  ;;  %v654_v43 = vsel %vm629_vm10, %v624_v24, 0.0 }
 0x201   :  { %vm583_vm12 = vcmp.ge.f32.partialorder %v527_v15, 0.0  ;;  %v599_v9 = vmul.f32 0.02, %v527_v15  ;;  %v519_v20 = vadd.f32 %v1110_v55, %v518_v57  ;;  %v622_v28 = vsel %vm590_vm0, %v554_v60, %v606_v2 }
 0x202   :  { %v770_v61 = vpop.f32.mrf.mxu0  ;;  %v640_v51 = vsel %vm629_vm10, %v622_v28, 0.0 }
 0x203   :  { %v615_v62 = vsel %vm583_vm12, %v527_v15, %v599_v9  ;;  %vm581_vm13 = vcmp.ge.f32.partialorder %v519_v20, 0.0  ;;  %v597_v11 = vmul.f32 0.02, %v519_v20  ;;  %v530_v30 = vadd.f32 %v770_v61, %v1110_v55 }
 0x204   :  { %v644_v0 = vsel %vm629_vm10, %v615_v62, 0.0  ;;  %v521_v1 = vpop.f32.mrf.mxu0 }
 0x205   :  { %v613_v45 = vsel %vm581_vm13, %v519_v20, %v597_v11  ;;  %vm584_vm14 = vcmp.ge.f32.partialorder %v530_v30, 0.0  ;;  %v600_v21 = vmul.f32 0.02, %v530_v30  ;;  %v646_v3 = vadd.f32 %v645_v59, %v644_v0 }
 0x206   :  { %v630_v4 = vsel %vm629_vm10, %v613_v45, 0.0  ;;  %v522_v17 = vadd.f32 %v1110_v55, %v521_v1  ;;  %v781_v52 = vpop.f32.mrf.mxu1 }
 0x207   :  { %v616_v6 = vsel %vm584_vm14, %v530_v30, %v600_v21  ;;  %v575_v37 = vadd.f32 %v781_v52, %v1110_v55  ;;  %v632_v8 = vadd.f32 %v631_v18, %v630_v4  ;;  %v648_v5 = vadd.f32 %v647_v27, %v646_v3 }
 0x208   :  { %vm582_vm1 = vcmp.ge.f32.partialorder %v522_v17, 0.0  ;;  %v598_v22 = vmul.f32 0.02, %v522_v17  ;;  %v566_v26 = vpop.f32.mrf.mxu1  ;;  %v651_v56 = vsel %vm629_vm10, %v616_v6, 0.0 }
 0x209   :  { %vm595_vm2 = vcmp.ge.f32.partialorder %v575_v37, 0.0  ;;  %v611_v48 = vmul.f32 0.02, %v575_v37  ;;  %v567_v23 = vadd.f32 %v1110_v55, %v566_v26  ;;  %v653_v25 = vadd.f32 %v652_v16, %v651_v56 }
 0x20a   :  { %v614_v38 = vsel %vm582_vm1, %v522_v17, %v598_v22  ;;  %v782_v29 = vpop.f32.mrf.mxu1  ;;  %v634_v34 = vadd.f32 %v633_v7, %v632_v8 }
 0x20b   :  { %v637_v31 = vsel %vm629_vm10, %v614_v38, 0.0  ;;  %v627_v32 = vsel %vm595_vm2, %v575_v37, %v611_v48  ;;  %vm593_vm3 = vcmp.ge.f32.partialorder %v567_v23, 0.0  ;;  %v609_v49 = vmul.f32 0.02, %v567_v23 }
 0x20c   :  { %v649_v33 = vsel %vm629_vm10, %v627_v32, 0.0  ;;  %v578_v35 = vadd.f32 %v782_v29, %v1110_v55  ;;  %v569_v36 = vpop.f32.mrf.mxu1  ;;  %v639_v39 = vadd.f32 %v638_v19, %v637_v31  ;;  %v655_v15 = vadd.f32 %v654_v43, %v653_v25 }
 0x20d   :  { %v650_v40 = vadd.f32 %v649_v33, %v648_v5  ;;  %v625_v41 = vsel %vm593_vm3, %v567_v23, %v609_v49  ;;  %v570_v42 = vadd.f32 %v1110_v55, %v569_v36 }
 0x20e   :  { %v635_v44 = vsel %vm629_vm10, %v625_v41, 0.0  ;;  %vm596_vm4 = vcmp.ge.f32.partialorder %v578_v35, 0.0  ;;  %v612_v46 = vmul.f32 0.02, %v578_v35  ;;  %v641_v54 = vadd.f32 %v640_v51, %v639_v39 }
 0x20f   :  { %v661_v47 = vmul.f32 0.25, %v650_v40  ;;  %v636_v14 = vadd.f32 %v635_v44, %v634_v34  ;;  %vm594_vm5 = vcmp.ge.f32.partialorder %v570_v42, 0.0  ;;  %v610_v50 = vmul.f32 0.02, %v570_v42 }
 0x210   :  { %v628_v10 = vsel %vm596_vm4, %v578_v35, %v612_v46 }
 0x211   :  { %665 = vst.msk [vmem:[%s1169_s8 + $0x10] sm:$0xff] %vm629_vm10, %v661_v47  ;;  %v659_v55 = vmul.f32 0.25, %v636_v14  ;;  %v656_v53 = vsel %vm629_vm10, %v628_v10, 0.0  ;;  %v626_v13 = vsel %vm594_vm5, %v570_v42, %v610_v50 }
 0x212   :  { %v657_v57 = vadd.f32 %v656_v53, %v655_v15  ;;  %v642_v58 = vsel %vm629_vm10, %v626_v13, 0.0 }
 0x213   :  { %663 = vst.msk [vmem:[%s1169_s8] sm:$0xff] %vm629_vm10, %v659_v55  ;;  %v643_v9 = vadd.f32 %v642_v58, %v641_v54 }
 0x214   :  { %v662_v20 = vmul.f32 0.25, %v657_v57 }
 0x215   :  { %v660_v59 = vmul.f32 0.25, %v643_v9 }
 0x216   :  { %666 = vst.msk [vmem:[%s1169_s8 + $0x18] sm:$0xff] %vm629_vm10, %v662_v20 }
 0x217   :  { %664 = vst.msk [vmem:[%s1169_s8 + $0x8] sm:$0xff] %vm629_vm10, %v660_v59 }

// kernel: _lambda_.5
= control target key start
LH: loop header
LB: loop body
LE: loop exit
PB: predicated region body
PF: predicated region fallthrough
CT: control target
= control target key end

     0   :  { %s1392_s0 = inlined_call_operand.vmem [shape: f32[2,24], index: 0, kind: input, shape index: {}]   ;;  %s1393_s1 = inlined_call_operand.vmem [shape: f32[24,24], index: 1, kind: input, shape index: {}]   ;;  %s1394_s2 = inlined_call_operand.vmem [shape: f32[1,24], index: 2, kind: input, shape index: {}]   ;;  %s1395_s3 = inlined_call_operand.vmem [shape: f32[24,32], index: 3, kind: input, shape index: {}]   ;;  %s1396_s4 = inlined_call_operand.vmem [shape: f32[24,32], index: 4, kind: input, shape index: {}]   ;;  %s1397_s5 = inlined_call_operand.vmem [shape: f32[1,32], index: 5, kind: input, shape index: {}]   ;;  %s1398_s6 = inlined_call_operand.vmem [shape: f32[32,32], index: 6, kind: input, shape index: {}]   ;;  %s1399_s7 = inlined_call_operand.vmem [shape: f32[1,32], index: 7, kind: input, shape index: {}]   ;;  %s1400_s8 = inlined_call_operand.vmem [shape: f32[32,32], index: 8, kind: input, shape index: {}]   ;;  %s1401_s9 = inlined_call_operand.vmem [shape: f32[1,32], index: 9, kind: input, shape index: {}]   ;;  %s1402_s10 = inlined_call_operand.vmem [shape: f32[32,16], index: 10, kind: input, shape index: {}]   ;;  %s1403_s11 = inlined_call_operand.vmem [shape: f32[32,16], index: 11, kind: input, shape index: {}]   ;;  %s1404_s12 = inlined_call_operand.vmem [shape: f32[1,16], index: 12, kind: input, shape index: {}]   ;;  %s1405_s13 = inlined_call_operand.vmem [shape: f32[16,16], index: 13, kind: input, shape index: {}]   ;;  %s1406_s14 = inlined_call_operand.vmem [shape: f32[1,16], index: 14, kind: input, shape index: {}]   ;;  %s1407_s15 = inlined_call_operand.vmem [shape: f32[16,16], index: 15, kind: input, shape index: {}]   ;;  %s1408_s16 = inlined_call_operand.vmem [shape: f32[1,16], index: 16, kind: input, shape index: {}]   ;;  %s1409_s17 = inlined_call_operand.vmem [shape: f32[16,4], index: 17, kind: input, shape index: {}]   ;;  %s1410_s18 = inlined_call_operand.vmem [shape: f32[1,4], index: 18, kind: input, shape index: {}]   ;;  %s1411_s19 = inlined_call_operand.hbm [shape: f32[2,4], index: 19, kind: output, shape index: {}]  }
   0x1   :  { %1414 = sst [smem:[#allocation5_spill]] %s1392_s0 }
   0x2   :  { %1415 = sst [smem:[#allocation6_spill]] %s1393_s1 }
   0x3   :  { %1416 = sst [smem:[#allocation7_spill]] %s1394_s2 }
   0x4   :  { %1417 = sst [smem:[#allocation8_spill]] %s1395_s3 }
   0x5   :  { %s1418_s20 = sld [smem:[#allocation6_spill]]  ;;  %v1102_v1 = vmov 0.0   ;;  %vm1103_vm0 = vmmov 0  }
   0x6   :  { %981 = vmatprep.subr.mxu0 %v1102_v1  ;;  %987 = vmatprep.mubr.msk.f32.mxu0 %vm1103_vm0, %v1102_v1 }
   0xb   :  { %v66_v0 = vld [vmem:[%s1418_s20 + $0x10] sm:$0xff]  ;;  %v65_v2 = vld [vmem:[%s1418_s20 + $0x8] sm:$0xff] }
   0xc   :  { %24 = vsyncpa [#allocation3], 0  ;;  %982 = vmatpush3.msra.mxu0 %v66_v0  ;;  %990 = vmatprep.subr.mxu1 %v1102_v1  ;;  %v64_v3 = vld [vmem:[%s1418_s20] sm:$0xff]  ;;  %s1419_s25 = sld [smem:[#allocation5_spill]]  ;;  %vm74_vm1 = vcmask 195584   ;;  %v156_v6 = vld [vmem:[%s1396_s4 + $0x10] sm:$0xff] }
   0xd   :  { %983 = vmatprep.subr.mxu0 %v1102_v1  ;;  %996 = vmatprep.mubr.msk.f32.mxu1 %vm1103_vm0, %v1102_v1  ;;  %s1420_s27 = sld [smem:[#allocation8_spill]]  ;;  %v155_v8 = vld [vmem:[%s1396_s4 + $0x8] sm:$0xff]  ;;  %v154_v10 = vld [vmem:[%s1396_s4] sm:$0xff]  ;;  %v161_v16 = vld [vmem:[%s1398_s6 + $0x18] sm:$0xff]  ;;  %vm326_vm4 = vcmask 261120   ;;  %vm656_vm7 = vcmask 130048  }
   0xe   :  { %984 = vmatpush3.msra.mxu0 %v65_v2  ;;  %s1421_s3 = sld [smem:[#allocation7_spill]]  ;;  %v160_v18 = vld [vmem:[%s1398_s6 + $0x10] sm:$0xff]  ;;  %v159_v19 = vld [vmem:[%s1398_s6 + $0x8] sm:$0xff]  ;;  %v158_v20 = vld [vmem:[%s1398_s6] sm:$0xff]  ;;  %vm895_vm9 = vcmask 25600  }
   0xf   :  { %985 = vmatprep.subr.mxu0 %v1102_v1  ;;  %v166_v21 = vld [vmem:[%s1400_s8 + $0x18] sm:$0xff]  ;;  %v925_v22 = vld [vmem:[%s1397_s5] ss:$0 sm:$0xff]  ;;  %v165_v30 = vld [vmem:[%s1400_s8 + $0x10] sm:$0xff] }
  0x10   :  { %986 = vmatpush3.msra.mxu0 %v64_v3  ;;  %v164_v31 = vld [vmem:[%s1400_s8 + $0x8] sm:$0xff]  ;;  %v163_v32 = vld [vmem:[%s1400_s8] sm:$0xff]  ;;  %v486_v33 = vld [vmem:[%s1402_s10 + $0x18] sm:$0xff] }
  0x11   :  { %999 = vmatprep.subr.mxu0 %v1102_v1  ;;  %v927_v34 = vld [vmem:[%s1399_s7] ss:$0 sm:$0xff]  ;;  %v490_v39 = vld [vmem:[%s1403_s11 + $0x18] sm:$0xff]  ;;  %v485_v41 = vld [vmem:[%s1402_s10 + $0x10] sm:$0xff] }
  0x12   :  { %v63_v4 = vld [vmem:[%s1419_s25] sm:$0x3]  ;;  %v489_v42 = vld [vmem:[%s1403_s11 + $0x10] sm:$0xff]  ;;  %v484_v43 = vld [vmem:[%s1402_s10 + $0x8] sm:$0xff] }
  0x13   :  { %988 = vmatmul.mubr.msk.f32.vlgmr.msra.gmra.mxu0 %vm74_vm1, %v63_v4  ;;  %v153_v5 = vld [vmem:[%s1420_s27 + $0x10] sm:$0xff]  ;;  %v152_v7 = vld [vmem:[%s1420_s27 + $0x8] sm:$0xff]  ;;  %v151_v9 = vld [vmem:[%s1420_s27] sm:$0xff] }
  0x14   :  { %1005 = vmatprep.mubr.msk.f32.mxu0 %vm1103_vm0, %v1102_v1  ;;  %991 = vmatpush3.msra.mxu1 %v153_v5  ;;  %v922_v11 = vld [vmem:[%s1421_s3] ss:$0 sm:$0xff]  ;;  %v488_v44 = vld [vmem:[%s1403_s11 + $0x8] sm:$0xff] }
  0x15   :  { %1000 = vmatpush3.msra.mxu0 %v156_v6  ;;  %992 = vmatprep.subr.mxu1 %v1102_v1  ;;  %v483_v45 = vld [vmem:[%s1402_s10] sm:$0xff]  ;;  %v493_v52 = vld [vmem:[%s1405_s13 + $0x8] sm:$0xff] }
  0x16   :  { %1001 = vmatprep.subr.mxu0 %v1102_v1  ;;  %993 = vmatpush3.msra.mxu1 %v152_v7  ;;  %v487_v46 = vld [vmem:[%s1403_s11] sm:$0xff]  ;;  %v496_v62 = vld [vmem:[%s1407_s15 + $0x8] sm:$0xff] }
  0x17   :  { %1002 = vmatpush3.msra.mxu0 %v155_v8  ;;  %994 = vmatprep.subr.mxu1 %v1102_v1  ;;  %v929_v47 = vld [vmem:[%s1401_s9] ss:$0 sm:$0xff]  ;;  %v814_v7 = vld [vmem:[%s1409_s17 + $0x8] sm:$0xff] }
  0x18   :  { %1003 = vmatprep.subr.mxu0 %v1102_v1  ;;  %995 = vmatpush3.msra.mxu1 %v151_v9  ;;  %v492_v53 = vld [vmem:[%s1405_s13] sm:$0xff] }
  0x19   :  { %1004 = vmatpush3.msra.mxu0 %v154_v10  ;;  %1008 = vmatprep.subr.mxu1 %v1102_v1  ;;  %v932_v54 = vld [vmem:[%s1404_s12] ss:$0 sm:$0xff] }
  0x1a   :  { %1019 = vmatprep.subr.mxu0 %v1102_v1  ;;  %v495_v63 = vld [vmem:[%s1407_s15] sm:$0xff] }
  0x1b   :  { %v934_v0 = vld [vmem:[%s1406_s14] ss:$0 sm:$0xff] }
  0x1c   :  { %v813_v8 = vld [vmem:[%s1409_s17] sm:$0xff] }
  0x1d   :  { %v936_v9 = vld [vmem:[%s1408_s16] ss:$0 sm:$0xff]  ;;  %s1104_s16 = smov [#allocation2]  }
  0x1e   :  { %s914_s17 = sshll.u32 %s1104_s16, 4  ;;  %s915_s17 = int_to_ptr.vmem [resolvable:$true] %s914_s17 }
  0x1f   :  { %p1085_p1 = scmp.lt.s32.totalorder %s915_s17, %s915_s17 }
  0xd3   :  { %v144_v12 = vpop.f32.mrf.mxu0 }
  0xd4   :  { %v145_v13 = vadd.f32 %v922_v11, %v144_v12 }
  0xd5   :  { %v989_v14 = vpop.f32.mrf.mxu0 }
  0xd6   :  { %vm148_vm2 = vcmp.ge.f32.partialorder %v145_v13, 0.0  ;;  %v149_v15 = vmul.f32 0.2, %v145_v13  ;;  %v938_v14 = vld [vmem:[%s1410_s18] ss:$0 sm:$0xff]  ;;  %s1080_s18 = scalar_lea.vmem %s915_s17, 32 }
  0xd7   :  { %p1081_p0 = scmp.ne.s32.totalorder %s915_s17, %s1080_s18  ;;  %p1086_p2 = scmp.lt.s32.totalorder %s1080_s18, %s1080_s18 }
  0xd8   :  { %v150_v17 = vsel %vm148_vm2, %v145_v13, %v149_v15 }
  0xd9   :  { %997 = vmatmul.mubr.msk.f32.vlgmr.msra.gmra.mxu1 %vm74_vm1, %v150_v17  ;;  %1006 = vmatmul.mubr.msk.f32.vlgmr.msra.gmra.mxu0 %vm74_vm1, %v150_v17  ;;  %p1087_p3 = por %p1086_p2, %p1085_p1 }
  0xda   :  { %1009 = vmatpush3.msra.mxu1 %v161_v16  ;;  %1016 = vmatprep.mubr.msk.f32.mxu1 %vm1103_vm0, %v1102_v1 }
  0xdb   :  { %1010 = vmatprep.subr.mxu1 %v1102_v1  ;;  %1027 = vmatprep.mubr.msk.f32.mxu0 %vm1103_vm0, %v1102_v1  ;;  %p1088_p4 = pnand %p1087_p3, %p1081_p0 }
  0xdc   :  { %1011 = vmatpush3.msra.mxu1 %v160_v18  ;;  %1020 = vmatpush3.msra.mxu0 %v166_v21 }
  0xdd   :  { %1012 = vmatprep.subr.mxu1 %v1102_v1  ;;  %1021 = vmatprep.subr.mxu0 %v1102_v1 }
  0xde   :  { %1013 = vmatpush3.msra.mxu1 %v159_v19  ;;  %1022 = vmatpush3.msra.mxu0 %v165_v30 }
  0xdf   :  { %1014 = vmatprep.subr.mxu1 %v1102_v1  ;;  %1023 = vmatprep.subr.mxu0 %v1102_v1 }
  0xe0   :  { %1015 = vmatpush3.msra.mxu1 %v158_v20  ;;  %1024 = vmatpush3.msra.mxu0 %v164_v31 }
  0xe1   :  { %1030 = vmatprep.subr.mxu1 %v1102_v1  ;;  %1025 = vmatprep.subr.mxu0 %v1102_v1 }
  0xe2   :  { %1026 = vmatpush3.msra.mxu0 %v163_v32 }
  0xe3   :  { %1041 = vmatprep.subr.mxu0 %v1102_v1 }
 0x199   :  { %v237_v23 = vpop.f32.mrf.mxu1  ;;  %v313_v24 = vpop.f32.mrf.mxu0 }
 0x19a   :  { %v314_v25 = vadd.f32 %v925_v22, %v313_v24 }
 0x19b   :  { %v998_v26 = vpop.f32.mrf.mxu1  ;;  %v1007_v27 = vpop.f32.mrf.mxu0 }
 0x19c   :  { %vm317_vm3 = vcmp.ge.f32.partialorder %v314_v25, 0.0  ;;  %v318_v28 = vmul.f32 0.2, %v314_v25 }
 0x19e   :  { %v319_v29 = vsel %vm317_vm3, %v314_v25, %v318_v28 }
 0x19f   :  { %1017 = vmatmul.mubr.msk.f32.vlgmr.msra.gmra.mxu1 %vm326_vm4, %v319_v29 }
 0x1a0   :  { %1038 = vmatprep.mubr.msk.f32.mxu1 %vm1103_vm0, %v1102_v1  ;;  %1031 = vmatpush3.msra.mxu1 %v486_v33 }
 0x1a1   :  { %1032 = vmatprep.subr.mxu1 %v1102_v1 }
 0x1a2   :  { %1033 = vmatpush3.msra.mxu1 %v485_v41 }
 0x1a3   :  { %1034 = vmatprep.subr.mxu1 %v1102_v1 }
 0x1a4   :  { %1035 = vmatpush3.msra.mxu1 %v484_v43 }
 0x1a5   :  { %1036 = vmatprep.subr.mxu1 %v1102_v1 }
 0x1a6   :  { %1037 = vmatpush3.msra.mxu1 %v483_v45 }
 0x1a7   :  { %1052 = vmatprep.subr.mxu1 %v1102_v1 }
 0x25f   :  { %v396_v35 = vpop.f32.mrf.mxu1 }
 0x260   :  { %v397_v36 = vadd.f32 %v927_v34, %v396_v35 }
 0x261   :  { %v1018_v37 = vpop.f32.mrf.mxu1 }
 0x262   :  { %vm400_vm5 = vcmp.ge.f32.partialorder %v397_v36, 0.0  ;;  %v401_v38 = vmul.f32 0.2, %v397_v36 }
 0x264   :  { %v402_v40 = vsel %vm400_vm5, %v397_v36, %v401_v38 }
 0x265   :  { %1028 = vmatmul.mubr.msk.f32.vlgmr.msra.gmra.mxu0 %vm326_vm4, %v402_v40 }
 0x266   :  { %1042 = vmatpush3.msra.mxu0 %v490_v39  ;;  %1049 = vmatprep.mubr.msk.f32.mxu0 %vm1103_vm0, %v1102_v1 }
 0x267   :  { %1043 = vmatprep.subr.mxu0 %v1102_v1 }
 0x268   :  { %1044 = vmatpush3.msra.mxu0 %v489_v42 }
 0x269   :  { %1045 = vmatprep.subr.mxu0 %v1102_v1 }
 0x26a   :  { %1046 = vmatpush3.msra.mxu0 %v488_v44 }
 0x26b   :  { %1047 = vmatprep.subr.mxu0 %v1102_v1 }
 0x26c   :  { %1048 = vmatpush3.msra.mxu0 %v487_v46 }
 0x26d   :  { %1066 = vmatprep.subr.mxu0 %v1102_v1 }
 0x325   :  { %v478_v48 = vpop.f32.mrf.mxu0 }
 0x326   :  { %v479_v49 = vadd.f32 %v929_v47, %v478_v48 }
 0x327   :  { %v1029_v50 = vpop.f32.mrf.mxu0 }
 0x328   :  { %v482_v51 = vadd.f32 %v479_v49, %v237_v23 }
 0x32a   :  { %1039 = vmatmul.mubr.msk.f32.vlgmr.msra.gmra.mxu1 %vm326_vm4, %v482_v51  ;;  %1050 = vmatmul.mubr.msk.f32.vlgmr.msra.gmra.mxu0 %vm326_vm4, %v482_v51 }
 0x32b   :  { %1056 = vmatprep.mubr.msk.f32.mxu1 %vm1103_vm0, %v1102_v1  ;;  %1070 = vmatprep.mubr.msk.f32.mxu0 %vm1103_vm0, %v1102_v1 }
 0x32c   :  { %1053 = vmatpush3.msra.mxu1 %v493_v52  ;;  %1067 = vmatpush3.msra.mxu0 %v814_v7 }
 0x32d   :  { %1054 = vmatprep.subr.mxu1 %v1102_v1  ;;  %1068 = vmatprep.subr.mxu0 %v1102_v1 }
 0x32e   :  { %1055 = vmatpush3.msra.mxu1 %v492_v53  ;;  %1069 = vmatpush3.msra.mxu0 %v813_v8 }
 0x32f   :  { %1059 = vmatprep.subr.mxu1 %v1102_v1 }
 0x3ea   :  { %v567_v55 = vpop.f32.mrf.mxu1  ;;  %v643_v56 = vpop.f32.mrf.mxu0 }
 0x3eb   :  { %v644_v57 = vadd.f32 %v932_v54, %v643_v56 }
 0x3ec   :  { %v1040_v58 = vpop.f32.mrf.mxu1  ;;  %v1051_v59 = vpop.f32.mrf.mxu0 }
 0x3ed   :  { %vm647_vm6 = vcmp.ge.f32.partialorder %v644_v57, 0.0  ;;  %v648_v60 = vmul.f32 0.2, %v644_v57 }
 0x3ef   :  { %v649_v61 = vsel %vm647_vm6, %v644_v57, %v648_v60 }
 0x3f0   :  { %1057 = vmatmul.mubr.msk.f32.vlgmr.msra.gmra.mxu1 %vm656_vm7, %v649_v61 }
 0x3f1   :  { %1063 = vmatprep.mubr.msk.f32.mxu1 %vm1103_vm0, %v1102_v1  ;;  %1060 = vmatpush3.msra.mxu1 %v496_v62 }
 0x3f2   :  { %1061 = vmatprep.subr.mxu1 %v1102_v1 }
 0x3f3   :  { %1062 = vmatpush3.msra.mxu1 %v495_v63 }
 0x4b0   :  { %v726_v2 = vpop.f32.mrf.mxu1 }
 0x4b1   :  { %v727_v3 = vadd.f32 %v934_v0, %v726_v2 }
 0x4b2   :  { %v1058_v4 = vpop.f32.mrf.mxu1 }
 0x4b3   :  { %vm730_vm8 = vcmp.ge.f32.partialorder %v727_v3, 0.0  ;;  %v731_v5 = vmul.f32 0.2, %v727_v3 }
 0x4b5   :  { %v732_v6 = vsel %vm730_vm8, %v727_v3, %v731_v5 }
 0x4b6   :  { %1064 = vmatmul.mubr.msk.f32.vlgmr.msra.gmra.mxu1 %vm656_vm7, %v732_v6 }
 0x576   :  { %v808_v10 = vpop.f32.mrf.mxu1 }
 0x577   :  { %v809_v11 = vadd.f32 %v936_v9, %v808_v10 }
 0x578   :  { %v1065_v12 = vpop.f32.mrf.mxu1 }
 0x579   :  { %v812_v13 = vadd.f32 %v809_v11, %v567_v55 }
 0x57b   :  { %1071 = vmatmul.mubr.msk.f32.vlgmr.msra.gmra.mxu0 %vm656_vm7, %v812_v13 }
 0x63b   :  { %v891_v1 = vpop.f32.mrf.mxu0 }
 0x63c   :  { %v892_v15 = vadd.f32 %v938_v14, %v891_v1 }
 0x63d   :  { %v1072_v16 = vpop.f32.mrf.mxu0 }
 0x63e   :  { %v896_v17 = vsel %vm895_vm9, %v892_v15, -inf }
 0x63f   :  { %897 = vmax.xlane.f32.xlu0 %v896_v17 }
 0x6c8   :  { %v898_v18 = vpop.xlane.xlu0 %897 }
 0x6c9   :  { %v899_v19 = vsub.f32 %v892_v15, %v898_v18 }
 0x6cb   :  { %v900_v20 = vmul.f32 1.442695, %v899_v19 }
 0x6cd   :  { %1076 = vpow2.f32 %v900_v20 }
 0x6da   :  { %v1077_v21 = vpop.eup %1076 }
 0x6db   :  { %v902_v22 = vsel %vm895_vm9, %v1077_v21, 0.0 }
 0x6dc   :  { %903 = vadd.xlane.f32.xlu0 %v902_v22 }
 0x765   :  { %v904_v23 = vpop.xlane.xlu0 %903 }
 0x766   :  { %1078 = vrcp.f32 %v904_v23 }
 0x773   :  { %v1079_v24 = vpop.eup %1078 }
 0x774   :  { %v906_v25 = vmul.f32 %v1079_v24, %v1077_v21 }
 0x776   :  { %907 = vst.msk [vmem:[#allocation2] sm:$0x3] %vm895_vm9, %v906_v25 }
 0x777   :  { %1091 = shalt.err (!%p1088_p4)
}
 0x778   :  { %917 = dma.vmem_to_hbm [thread:$0]  %s915_s17, 32, %s1411_s19, [#allocation3]  }
 0x779   :  { %1100 = dma.done.wait [#allocation3], 32  }
 0x77a   :  { %1101 = vsyncadd [#allocation3], 4294967264 }
 0x77b   :  { %921 = vsyncpa [#allocation3], 1 }

</bundles_post_ra>
